<compile_context>
chip_gen: v7x
topology: tpu7x:2x2x1
jax: 0.10.0
libtpu: 0.0.40
codegen_flags: <defaults>
</compile_context>

<pallas_src>
import functools

import jax
import jax.numpy as jnp
from jax import lax
from jax.experimental import pallas as pl
from jax.experimental.pallas import tpu as pltpu


def _vmem():
    return pl.BlockSpec(memory_space=pltpu.MemorySpace.VMEM)


def _sigmoid_eup(v):
    # sigmoid(v) == 0.5 * tanh(0.5 * v) + 0.5  -> one EUP op (the EUP slot is
    # otherwise idle here), instead of exp + f32 divide on the VALU chain.
    return 0.5 * jnp.tanh(0.5 * v) + 0.5


def fused_forward_kernel(
    tok_ref,                                    # (L*Bp, 1) int32; row = t*Bp + b
    wcr_ref, wcz_ref, wcn_ref,                  # (V, H) bf16: embedding @ W_i{r,z,n}
    br_ref, bz_ref, bin_ref, bhn_ref,           # (1, H) f32 biases (r/z pre-folded)
    whr_ref, whz_ref, whn_ref,                  # (H, H) bf16 recurrent weights
    wa_ref, ba_ref,                             # (M, 2M) bf16, (1, 2M) f32
    wb_ref, bb_ref,                             # (2M, 2M) bf16 block-diag, (1, 2M) f32
    wfc_ref, bfc_ref,                           # (2M, C) bf16, (1, C) f32
    out_ref,                                    # (Bp, C) f32 log-probs
    *, L, Bp, H,
):
    # ---- one-hot tokens (V is tiny; gather stays on the MXU) ----------------
    V = wcr_ref.shape[0]
    tok = tok_ref[...]                                                 # (L*Bp, 1)
    iota = lax.broadcasted_iota(jnp.int32, (tok.shape[0], V), 1)
    onehot = jnp.where(tok == iota, 1.0, 0.0).astype(jnp.bfloat16)     # (L*Bp, V)

    # ---- folded input-to-hidden gate projections, per gate (lane-aligned) ---
    # Done once before the recurrence; biases (incl. folded hidden r/z biases)
    # added here so the loop body has no bias broadcasts for r/z.
    gx_r = jnp.dot(onehot, wcr_ref[...], preferred_element_type=jnp.float32) + br_ref[...]
    gx_z = jnp.dot(onehot, wcz_ref[...], preferred_element_type=jnp.float32) + bz_ref[...]
    gx_n = jnp.dot(onehot, wcn_ref[...], preferred_element_type=jnp.float32) + bin_ref[...]

    wh_r = whr_ref[...]
    wh_z = whz_ref[...]
    wh_n = whn_ref[...]
    bhn = jnp.broadcast_to(bhn_ref[...], (Bp, H))   # hoisted once (not CSE'd)

    # ---- GRU layer-0 forward recurrence (PyTorch gate equations) ------------
    # Static Python unroll: L is small & fixed, concrete t gives static,
    # tile-aligned row slices (free vreg picks) and full scheduler visibility.
    h = jnp.zeros((Bp, H), jnp.float32)
    for t in range(L):
        lo = t * Bp
        gr = gx_r[lo:lo + Bp, :]
        gz = gx_z[lo:lo + Bp, :]
        gn = gx_n[lo:lo + Bp, :]
        hb = h.astype(jnp.bfloat16)
        ghr = jnp.dot(hb, wh_r, preferred_element_type=jnp.float32)
        ghz = jnp.dot(hb, wh_z, preferred_element_type=jnp.float32)
        ghn = jnp.dot(hb, wh_n, preferred_element_type=jnp.float32)
        r = _sigmoid_eup(gr + ghr)
        z = _sigmoid_eup(gz + ghz)
        n = jnp.tanh(gn + r * (ghn + bhn))
        h = (1.0 - z) * n + z * h

    # ---- packed classifier: 3 matmuls + log-softmax, all in vregs -----------
    h1 = jnp.maximum(
        jnp.dot(h.astype(jnp.bfloat16), wa_ref[...],
                preferred_element_type=jnp.float32) + ba_ref[...], 0.0)      # (Bp, 2M)
    h2 = (jnp.dot(h1.astype(jnp.bfloat16), wb_ref[...],
                  preferred_element_type=jnp.float32) + bb_ref[...])         # (Bp, 2M)
    logits = (jnp.dot(h2.astype(jnp.bfloat16), wfc_ref[...],
                      preferred_element_type=jnp.float32) + bfc_ref[...])    # (Bp, C)
    zc = logits - jnp.max(logits, axis=1, keepdims=True)
    out_ref[...] = zc - jnp.log(jnp.sum(jnp.exp(zc), axis=1, keepdims=True))


# ----------------------------------------------------------------------------
# Wrapper: pads batch to 8 sublanes, lays tokens out time-major, one pallas_call
# ----------------------------------------------------------------------------
def seq_to_label_forward(x, packed, cfg):
    B, L = x.shape
    H = cfg["hidden_gru_size"]
    C = cfg["num_classes"]
    Bp = max(8, ((B + 7) // 8) * 8)          # pad batch to a full sublane group

    tok = jnp.zeros((L, Bp), jnp.int32).at[:, :B].set(x.T.astype(jnp.int32))
    tok = tok.reshape(L * Bp, 1)             # row = t*Bp + b (padded b -> id 0)

    kernel = functools.partial(fused_forward_kernel, L=L, Bp=Bp, H=H)
    out = pl.pallas_call(
        kernel,
        out_shape=jax.ShapeDtypeStruct((Bp, C), jnp.float32),
        in_specs=[_vmem()] * 17,
        out_specs=_vmem(),
    )(tok,
      packed["wc_r"], packed["wc_z"], packed["wc_n"],
      packed["b_r"], packed["b_z"], packed["b_in"], packed["b_hn"],
      packed["wh_r"], packed["wh_z"], packed["wh_n"],
      packed["w_a"], packed["b_a"], packed["w_b"], packed["b_b"],
      packed["w_fc"], packed["b_fc"])
    return out[:B]


# ----------------------------------------------------------------------------
# One-time algebraic folding / packing of parameters (init-time, not per call)
# ----------------------------------------------------------------------------
def pack_params(p, cfg):
    H = cfg["hidden_gru_size"]
    M = H * cfg["num_gru_layers"]
    bf = lambda a: a.astype(jnp.bfloat16)

    wc = p["embedding"] @ p["gru_wih"]                      # (V, 3H) fold embedding
    whh, bih, bhh = p["gru_whh"], p["gru_bih"], p["gru_bhh"]
    zero = jnp.zeros((M, M), jnp.float32)
    return dict(
        wc_r=bf(wc[:, :H]), wc_z=bf(wc[:, H:2 * H]), wc_n=bf(wc[:, 2 * H:]),
        # r/z: input + hidden biases commute out of the gate -> fold together.
        b_r=bih[:, :H] + bhh[:, :H],
        b_z=bih[:, H:2 * H] + bhh[:, H:2 * H],
        b_in=bih[:, 2 * H:],
        b_hn=bhh[:, 2 * H:],                                # must stay inside r*(.)
        wh_r=bf(whh[:, :H]), wh_z=bf(whh[:, H:2 * H]), wh_n=bf(whh[:, 2 * H:]),
        # packed classifier
        w_a=bf(jnp.concatenate([p["lb1_w1"], p["lb2_w1"]], axis=1)),      # (M, 2M)
        b_a=jnp.concatenate([p["lb1_b1"], p["lb2_b1"]], axis=1),          # (1, 2M)
        w_b=bf(jnp.block([[p["lb1_w2"], zero], [zero, p["lb2_w2"]]])),    # (2M, 2M)
        b_b=jnp.concatenate([p["lb1_b2"], p["lb2_b2"]], axis=1),          # (1, 2M)
        w_fc=bf(jnp.concatenate([p["fc_w1"], p["fc_w2"]], axis=0)),       # (2M, C)
        b_fc=p["fc_b"],                                                   # (1, C)
    )


# ----------------------------------------------------------------------------
# Deterministic parameter init (PyTorch-style layout / uniform bounds)
# ----------------------------------------------------------------------------
def init_params(cfg, key):
    V = cfg["vocab_size"]
    E = cfg["embedding_dim"]
    H = cfg["hidden_gru_size"]
    ncls = cfg["num_classes"]
    M = H * cfg["num_gru_layers"]            # in_lin_size == in_betw_size

    keys = iter(jax.random.split(key, 32))

    def u(shape, fan_in):
        b = 1.0 / (fan_in ** 0.5)
        return jax.random.uniform(next(keys), shape, jnp.float32, -b, b)

    p = {"embedding": jax.random.normal(next(keys), (V, E), jnp.float32)}
    # GRU layer-0 forward params; PyTorch weight_ih_l0 is (3H, E), gate order
    # (r, z, n) -> stored pre-transposed as (E, 3H) for x @ W.
    p["gru_wih"] = u((E, 3 * H), H)
    p["gru_bih"] = u((1, 3 * H), H)
    p["gru_whh"] = u((H, 3 * H), H)
    p["gru_bhh"] = u((1, 3 * H), H)
    for blk in ("lb1", "lb2"):
        p[f"{blk}_w1"] = u((M, M), M)
        p[f"{blk}_b1"] = u((1, M), M)
        p[f"{blk}_w2"] = u((M, M), M)
        p[f"{blk}_b2"] = u((1, M), M)
    # final Linear(2M, ncls) stored as two (M, ncls) halves (concat rewrite).
    p["fc_w1"] = u((M, ncls), 2 * M)
    p["fc_w2"] = u((M, ncls), 2 * M)
    p["fc_b"] = u((1, ncls), 2 * M)
    return p


if __name__ == "__main__":
    cfg = dict(
        vocab_size=30,          # len(char_to_idx)
        embedding_dim=16,
        hidden_gru_size=32,
        num_gru_layers=1,       # Linear(h_n[0]) is only well-formed for 1 layer
        num_classes=5,
        dropout=0.5,            # identity at inference
        batch_size=2,
        seq_len=12,
    )
    assert cfg["hidden_gru_size"] * cfg["num_gru_layers"] == cfg["hidden_gru_size"]

    key = jax.random.PRNGKey(0)
    pkey, xkey = jax.random.split(key)
    params = init_params(cfg, pkey)
    packed = pack_params(params, cfg)
    x = jax.random.randint(xkey, (cfg["batch_size"], cfg["seq_len"]),
                           0, cfg["vocab_size"], dtype=jnp.int32)

    fwd = jax.jit(lambda xx: seq_to_label_forward(xx, packed, cfg))
    out = jax.block_until_ready(fwd(x))

    assert out.shape == (cfg["batch_size"], cfg["num_classes"]), out.shape
    assert bool(jnp.all(jnp.isfinite(out)))
    # log-softmax rows should sum to 1 in probability space
    assert bool(jnp.allclose(jnp.sum(jnp.exp(out), axis=1), 1.0, atol=1e-3))
    print("KERNEL_OK")
</pallas_src>

<mosaic_0001>
module attributes {stable_mosaic.version = 11 : i64} {
  func.func @fused_forward_kernel(%arg0: memref<96x1xi32, #tpu.memory_space<vmem>>, %arg1: memref<30x32xbf16, #tpu.memory_space<vmem>>, %arg2: memref<30x32xbf16, #tpu.memory_space<vmem>>, %arg3: memref<30x32xbf16, #tpu.memory_space<vmem>>, %arg4: memref<1x32xf32, #tpu.memory_space<vmem>>, %arg5: memref<1x32xf32, #tpu.memory_space<vmem>>, %arg6: memref<1x32xf32, #tpu.memory_space<vmem>>, %arg7: memref<1x32xf32, #tpu.memory_space<vmem>>, %arg8: memref<32x32xbf16, #tpu.memory_space<vmem>>, %arg9: memref<32x32xbf16, #tpu.memory_space<vmem>>, %arg10: memref<32x32xbf16, #tpu.memory_space<vmem>>, %arg11: memref<32x64xbf16, #tpu.memory_space<vmem>>, %arg12: memref<1x64xf32, #tpu.memory_space<vmem>>, %arg13: memref<64x64xbf16, #tpu.memory_space<vmem>>, %arg14: memref<1x64xf32, #tpu.memory_space<vmem>>, %arg15: memref<64x5xbf16, #tpu.memory_space<vmem>>, %arg16: memref<1x5xf32, #tpu.memory_space<vmem>>, %arg17: memref<8x5xf32, #tpu.memory_space<vmem>>) attributes {dimension_semantics = [], scalar_prefetch = 0 : i64, scratch_operands = 0 : i64, tpu.core_type = #tpu.core_type<tc>} {
    %c0 = arith.constant 0 : index
    %c0_0 = arith.constant 0 : index
    %0 = vector.load %arg0[%c0, %c0_0] : memref<96x1xi32, #tpu.memory_space<vmem>>, vector<96x1xi32>
    %1 = tpu.iota {dimensions = array<i32: 1>} : vector<96x30xi32>
    %2 = vector.broadcast %0 : vector<96x1xi32> to vector<96x30xi32>
    %3 = arith.cmpi eq, %2, %1 : vector<96x30xi32>
    %cst = arith.constant 1.000000e+00 : f32
    %cst_1 = arith.constant 0.000000e+00 : f32
    %4 = vector.broadcast %cst : f32 to vector<96x30xf32>
    %5 = vector.broadcast %cst_1 : f32 to vector<96x30xf32>
    %6 = arith.select %3, %4, %5 : vector<96x30xi1>, vector<96x30xf32>
    %7 = arith.truncf %6 : vector<96x30xf32> to vector<96x30xbf16>
    %c0_2 = arith.constant 0 : index
    %c0_3 = arith.constant 0 : index
    %8 = vector.load %arg1[%c0_2, %c0_3] : memref<30x32xbf16, #tpu.memory_space<vmem>>, vector<30x32xbf16>
    %cst_4 = arith.constant dense<0.000000e+00> : vector<96x32xf32>
    %9 = tpu.matmul %7, %8, %cst_4 {dimension_numbers = #tpu.dot_dimension_numbers<[1], [0], [0], [1], [0, 0, 1, 1], [], []>} : vector<96x30xbf16>, vector<30x32xbf16>, vector<96x32xf32> -> vector<96x32xf32>
    %c0_5 = arith.constant 0 : index
    %c0_6 = arith.constant 0 : index
    %10 = vector.load %arg4[%c0_5, %c0_6] : memref<1x32xf32, #tpu.memory_space<vmem>>, vector<1x32xf32>
    %11 = vector.broadcast %10 : vector<1x32xf32> to vector<96x32xf32>
    %12 = arith.addf %9, %11 : vector<96x32xf32>
    %c0_7 = arith.constant 0 : index
    %c0_8 = arith.constant 0 : index
    %13 = vector.load %arg2[%c0_7, %c0_8] : memref<30x32xbf16, #tpu.memory_space<vmem>>, vector<30x32xbf16>
    %cst_9 = arith.constant dense<0.000000e+00> : vector<96x32xf32>
    %14 = tpu.matmul %7, %13, %cst_9 {dimension_numbers = #tpu.dot_dimension_numbers<[1], [0], [0], [1], [0, 0, 1, 1], [], []>} : vector<96x30xbf16>, vector<30x32xbf16>, vector<96x32xf32> -> vector<96x32xf32>
    %c0_10 = arith.constant 0 : index
    %c0_11 = arith.constant 0 : index
    %15 = vector.load %arg5[%c0_10, %c0_11] : memref<1x32xf32, #tpu.memory_space<vmem>>, vector<1x32xf32>
    %16 = vector.broadcast %15 : vector<1x32xf32> to vector<96x32xf32>
    %17 = arith.addf %14, %16 : vector<96x32xf32>
    %c0_12 = arith.constant 0 : index
    %c0_13 = arith.constant 0 : index
    %18 = vector.load %arg3[%c0_12, %c0_13] : memref<30x32xbf16, #tpu.memory_space<vmem>>, vector<30x32xbf16>
    %cst_14 = arith.constant dense<0.000000e+00> : vector<96x32xf32>
    %19 = tpu.matmul %7, %18, %cst_14 {dimension_numbers = #tpu.dot_dimension_numbers<[1], [0], [0], [1], [0, 0, 1, 1], [], []>} : vector<96x30xbf16>, vector<30x32xbf16>, vector<96x32xf32> -> vector<96x32xf32>
    %c0_15 = arith.constant 0 : index
    %c0_16 = arith.constant 0 : index
    %20 = vector.load %arg6[%c0_15, %c0_16] : memref<1x32xf32, #tpu.memory_space<vmem>>, vector<1x32xf32>
    %21 = vector.broadcast %20 : vector<1x32xf32> to vector<96x32xf32>
    %22 = arith.addf %19, %21 : vector<96x32xf32>
    %c0_17 = arith.constant 0 : index
    %c0_18 = arith.constant 0 : index
    %23 = vector.load %arg8[%c0_17, %c0_18] : memref<32x32xbf16, #tpu.memory_space<vmem>>, vector<32x32xbf16>
    %c0_19 = arith.constant 0 : index
    %c0_20 = arith.constant 0 : index
    %24 = vector.load %arg9[%c0_19, %c0_20] : memref<32x32xbf16, #tpu.memory_space<vmem>>, vector<32x32xbf16>
    %c0_21 = arith.constant 0 : index
    %c0_22 = arith.constant 0 : index
    %25 = vector.load %arg10[%c0_21, %c0_22] : memref<32x32xbf16, #tpu.memory_space<vmem>>, vector<32x32xbf16>
    %c0_23 = arith.constant 0 : index
    %c0_24 = arith.constant 0 : index
    %26 = vector.load %arg7[%c0_23, %c0_24] : memref<1x32xf32, #tpu.memory_space<vmem>>, vector<1x32xf32>
    %27 = vector.shape_cast %26 : vector<1x32xf32> to vector<1x32xf32>
    %28 = vector.broadcast %27 : vector<1x32xf32> to vector<8x32xf32>
    %cst_25 = arith.constant 0.000000e+00 : f32
    %29 = vector.broadcast %cst_25 : f32 to vector<8x32xf32>
    %30 = vector.extract_strided_slice %12 {offsets = [0, 0], sizes = [8, 32], strides = [1, 1]} : vector<96x32xf32> to vector<8x32xf32>
    %31 = vector.extract_strided_slice %17 {offsets = [0, 0], sizes = [8, 32], strides = [1, 1]} : vector<96x32xf32> to vector<8x32xf32>
    %32 = vector.extract_strided_slice %22 {offsets = [0, 0], sizes = [8, 32], strides = [1, 1]} : vector<96x32xf32> to vector<8x32xf32>
    %33 = arith.truncf %29 : vector<8x32xf32> to vector<8x32xbf16>
    %cst_26 = arith.constant dense<0.000000e+00> : vector<8x32xf32>
    %34 = tpu.matmul %33, %23, %cst_26 {dimension_numbers = #tpu.dot_dimension_numbers<[1], [0], [0], [1], [0, 0, 1, 1], [], []>} : vector<8x32xbf16>, vector<32x32xbf16>, vector<8x32xf32> -> vector<8x32xf32>
    %cst_27 = arith.constant dense<0.000000e+00> : vector<8x32xf32>
    %35 = tpu.matmul %33, %24, %cst_27 {dimension_numbers = #tpu.dot_dimension_numbers<[1], [0], [0], [1], [0, 0, 1, 1], [], []>} : vector<8x32xbf16>, vector<32x32xbf16>, vector<8x32xf32> -> vector<8x32xf32>
    %cst_28 = arith.constant dense<0.000000e+00> : vector<8x32xf32>
    %36 = tpu.matmul %33, %25, %cst_28 {dimension_numbers = #tpu.dot_dimension_numbers<[1], [0], [0], [1], [0, 0, 1, 1], [], []>} : vector<8x32xbf16>, vector<32x32xbf16>, vector<8x32xf32> -> vector<8x32xf32>
    %37 = arith.addf %30, %34 : vector<8x32xf32>
    %cst_29 = arith.constant 5.000000e-01 : f32
    %38 = vector.broadcast %cst_29 : f32 to vector<8x32xf32>
    %39 = arith.mulf %38, %37 : vector<8x32xf32>
    %40 = math.tanh %39 : vector<8x32xf32>
    %cst_30 = arith.constant 5.000000e-01 : f32
    %41 = vector.broadcast %cst_30 : f32 to vector<8x32xf32>
    %42 = arith.mulf %41, %40 : vector<8x32xf32>
    %cst_31 = arith.constant 5.000000e-01 : f32
    %43 = vector.broadcast %cst_31 : f32 to vector<8x32xf32>
    %44 = arith.addf %42, %43 : vector<8x32xf32>
    %45 = arith.addf %31, %35 : vector<8x32xf32>
    %cst_32 = arith.constant 5.000000e-01 : f32
    %46 = vector.broadcast %cst_32 : f32 to vector<8x32xf32>
    %47 = arith.mulf %46, %45 : vector<8x32xf32>
    %48 = math.tanh %47 : vector<8x32xf32>
    %cst_33 = arith.constant 5.000000e-01 : f32
    %49 = vector.broadcast %cst_33 : f32 to vector<8x32xf32>
    %50 = arith.mulf %49, %48 : vector<8x32xf32>
    %cst_34 = arith.constant 5.000000e-01 : f32
    %51 = vector.broadcast %cst_34 : f32 to vector<8x32xf32>
    %52 = arith.addf %50, %51 : vector<8x32xf32>
    %53 = arith.addf %36, %28 : vector<8x32xf32>
    %54 = arith.mulf %44, %53 : vector<8x32xf32>
    %55 = arith.addf %32, %54 : vector<8x32xf32>
    %56 = math.tanh %55 : vector<8x32xf32>
    %cst_35 = arith.constant 1.000000e+00 : f32
    %57 = vector.broadcast %cst_35 : f32 to vector<8x32xf32>
    %58 = arith.subf %57, %52 : vector<8x32xf32>
    %59 = arith.mulf %58, %56 : vector<8x32xf32>
    %60 = arith.mulf %52, %29 : vector<8x32xf32>
    %61 = arith.addf %59, %60 : vector<8x32xf32>
    %62 = vector.extract_strided_slice %12 {offsets = [8, 0], sizes = [8, 32], strides = [1, 1]} : vector<96x32xf32> to vector<8x32xf32>
    %63 = vector.extract_strided_slice %17 {offsets = [8, 0], sizes = [8, 32], strides = [1, 1]} : vector<96x32xf32> to vector<8x32xf32>
    %64 = vector.extract_strided_slice %22 {offsets = [8, 0], sizes = [8, 32], strides = [1, 1]} : vector<96x32xf32> to vector<8x32xf32>
    %65 = arith.truncf %61 : vector<8x32xf32> to vector<8x32xbf16>
    %cst_36 = arith.constant dense<0.000000e+00> : vector<8x32xf32>
    %66 = tpu.matmul %65, %23, %cst_36 {dimension_numbers = #tpu.dot_dimension_numbers<[1], [0], [0], [1], [0, 0, 1, 1], [], []>} : vector<8x32xbf16>, vector<32x32xbf16>, vector<8x32xf32> -> vector<8x32xf32>
    %cst_37 = arith.constant dense<0.000000e+00> : vector<8x32xf32>
    %67 = tpu.matmul %65, %24, %cst_37 {dimension_numbers = #tpu.dot_dimension_numbers<[1], [0], [0], [1], [0, 0, 1, 1], [], []>} : vector<8x32xbf16>, vector<32x32xbf16>, vector<8x32xf32> -> vector<8x32xf32>
    %cst_38 = arith.constant dense<0.000000e+00> : vector<8x32xf32>
    %68 = tpu.matmul %65, %25, %cst_38 {dimension_numbers = #tpu.dot_dimension_numbers<[1], [0], [0], [1], [0, 0, 1, 1], [], []>} : vector<8x32xbf16>, vector<32x32xbf16>, vector<8x32xf32> -> vector<8x32xf32>
    %69 = arith.addf %62, %66 : vector<8x32xf32>
    %cst_39 = arith.constant 5.000000e-01 : f32
    %70 = vector.broadcast %cst_39 : f32 to vector<8x32xf32>
    %71 = arith.mulf %70, %69 : vector<8x32xf32>
    %72 = math.tanh %71 : vector<8x32xf32>
    %cst_40 = arith.constant 5.000000e-01 : f32
    %73 = vector.broadcast %cst_40 : f32 to vector<8x32xf32>
    %74 = arith.mulf %73, %72 : vector<8x32xf32>
    %cst_41 = arith.constant 5.000000e-01 : f32
    %75 = vector.broadcast %cst_41 : f32 to vector<8x32xf32>
    %76 = arith.addf %74, %75 : vector<8x32xf32>
    %77 = arith.addf %63, %67 : vector<8x32xf32>
    %cst_42 = arith.constant 5.000000e-01 : f32
    %78 = vector.broadcast %cst_42 : f32 to vector<8x32xf32>
    %79 = arith.mulf %78, %77 : vector<8x32xf32>
    %80 = math.tanh %79 : vector<8x32xf32>
    %cst_43 = arith.constant 5.000000e-01 : f32
    %81 = vector.broadcast %cst_43 : f32 to vector<8x32xf32>
    %82 = arith.mulf %81, %80 : vector<8x32xf32>
    %cst_44 = arith.constant 5.000000e-01 : f32
    %83 = vector.broadcast %cst_44 : f32 to vector<8x32xf32>
    %84 = arith.addf %82, %83 : vector<8x32xf32>
    %85 = arith.addf %68, %28 : vector<8x32xf32>
    %86 = arith.mulf %76, %85 : vector<8x32xf32>
    %87 = arith.addf %64, %86 : vector<8x32xf32>
    %88 = math.tanh %87 : vector<8x32xf32>
    %cst_45 = arith.constant 1.000000e+00 : f32
    %89 = vector.broadcast %cst_45 : f32 to vector<8x32xf32>
    %90 = arith.subf %89, %84 : vector<8x32xf32>
    %91 = arith.mulf %90, %88 : vector<8x32xf32>
    %92 = arith.mulf %84, %61 : vector<8x32xf32>
    %93 = arith.addf %91, %92 : vector<8x32xf32>
    %94 = vector.extract_strided_slice %12 {offsets = [16, 0], sizes = [8, 32], strides = [1, 1]} : vector<96x32xf32> to vector<8x32xf32>
    %95 = vector.extract_strided_slice %17 {offsets = [16, 0], sizes = [8, 32], strides = [1, 1]} : vector<96x32xf32> to vector<8x32xf32>
    %96 = vector.extract_strided_slice %22 {offsets = [16, 0], sizes = [8, 32], strides = [1, 1]} : vector<96x32xf32> to vector<8x32xf32>
    %97 = arith.truncf %93 : vector<8x32xf32> to vector<8x32xbf16>
    %cst_46 = arith.constant dense<0.000000e+00> : vector<8x32xf32>
    %98 = tpu.matmul %97, %23, %cst_46 {dimension_numbers = #tpu.dot_dimension_numbers<[1], [0], [0], [1], [0, 0, 1, 1], [], []>} : vector<8x32xbf16>, vector<32x32xbf16>, vector<8x32xf32> -> vector<8x32xf32>
    %cst_47 = arith.constant dense<0.000000e+00> : vector<8x32xf32>
    %99 = tpu.matmul %97, %24, %cst_47 {dimension_numbers = #tpu.dot_dimension_numbers<[1], [0], [0], [1], [0, 0, 1, 1], [], []>} : vector<8x32xbf16>, vector<32x32xbf16>, vector<8x32xf32> -> vector<8x32xf32>
    %cst_48 = arith.constant dense<0.000000e+00> : vector<8x32xf32>
    %100 = tpu.matmul %97, %25, %cst_48 {dimension_numbers = #tpu.dot_dimension_numbers<[1], [0], [0], [1], [0, 0, 1, 1], [], []>} : vector<8x32xbf16>, vector<32x32xbf16>, vector<8x32xf32> -> vector<8x32xf32>
    %101 = arith.addf %94, %98 : vector<8x32xf32>
    %cst_49 = arith.constant 5.000000e-01 : f32
    %102 = vector.broadcast %cst_49 : f32 to vector<8x32xf32>
    %103 = arith.mulf %102, %101 : vector<8x32xf32>
    %104 = math.tanh %103 : vector<8x32xf32>
    %cst_50 = arith.constant 5.000000e-01 : f32
    %105 = vector.broadcast %cst_50 : f32 to vector<8x32xf32>
    %106 = arith.mulf %105, %104 : vector<8x32xf32>
    %cst_51 = arith.constant 5.000000e-01 : f32
    %107 = vector.broadcast %cst_51 : f32 to vector<8x32xf32>
    %108 = arith.addf %106, %107 : vector<8x32xf32>
    %109 = arith.addf %95, %99 : vector<8x32xf32>
    %cst_52 = arith.constant 5.000000e-01 : f32
    %110 = vector.broadcast %cst_52 : f32 to vector<8x32xf32>
    %111 = arith.mulf %110, %109 : vector<8x32xf32>
    %112 = math.tanh %111 : vector<8x32xf32>
    %cst_53 = arith.constant 5.000000e-01 : f32
    %113 = vector.broadcast %cst_53 : f32 to vector<8x32xf32>
    %114 = arith.mulf %113, %112 : vector<8x32xf32>
    %cst_54 = arith.constant 5.000000e-01 : f32
    %115 = vector.broadcast %cst_54 : f32 to vector<8x32xf32>
    %116 = arith.addf %114, %115 : vector<8x32xf32>
    %117 = arith.addf %100, %28 : vector<8x32xf32>
    %118 = arith.mulf %108, %117 : vector<8x32xf32>
    %119 = arith.addf %96, %118 : vector<8x32xf32>
    %120 = math.tanh %119 : vector<8x32xf32>
    %cst_55 = arith.constant 1.000000e+00 : f32
    %121 = vector.broadcast %cst_55 : f32 to vector<8x32xf32>
    %122 = arith.subf %121, %116 : vector<8x32xf32>
    %123 = arith.mulf %122, %120 : vector<8x32xf32>
    %124 = arith.mulf %116, %93 : vector<8x32xf32>
    %125 = arith.addf %123, %124 : vector<8x32xf32>
    %126 = vector.extract_strided_slice %12 {offsets = [24, 0], sizes = [8, 32], strides = [1, 1]} : vector<96x32xf32> to vector<8x32xf32>
    %127 = vector.extract_strided_slice %17 {offsets = [24, 0], sizes = [8, 32], strides = [1, 1]} : vector<96x32xf32> to vector<8x32xf32>
    %128 = vector.extract_strided_slice %22 {offsets = [24, 0], sizes = [8, 32], strides = [1, 1]} : vector<96x32xf32> to vector<8x32xf32>
    %129 = arith.truncf %125 : vector<8x32xf32> to vector<8x32xbf16>
    %cst_56 = arith.constant dense<0.000000e+00> : vector<8x32xf32>
    %130 = tpu.matmul %129, %23, %cst_56 {dimension_numbers = #tpu.dot_dimension_numbers<[1], [0], [0], [1], [0, 0, 1, 1], [], []>} : vector<8x32xbf16>, vector<32x32xbf16>, vector<8x32xf32> -> vector<8x32xf32>
    %cst_57 = arith.constant dense<0.000000e+00> : vector<8x32xf32>
    %131 = tpu.matmul %129, %24, %cst_57 {dimension_numbers = #tpu.dot_dimension_numbers<[1], [0], [0], [1], [0, 0, 1, 1], [], []>} : vector<8x32xbf16>, vector<32x32xbf16>, vector<8x32xf32> -> vector<8x32xf32>
    %cst_58 = arith.constant dense<0.000000e+00> : vector<8x32xf32>
    %132 = tpu.matmul %129, %25, %cst_58 {dimension_numbers = #tpu.dot_dimension_numbers<[1], [0], [0], [1], [0, 0, 1, 1], [], []>} : vector<8x32xbf16>, vector<32x32xbf16>, vector<8x32xf32> -> vector<8x32xf32>
    %133 = arith.addf %126, %130 : vector<8x32xf32>
    %cst_59 = arith.constant 5.000000e-01 : f32
    %134 = vector.broadcast %cst_59 : f32 to vector<8x32xf32>
    %135 = arith.mulf %134, %133 : vector<8x32xf32>
    %136 = math.tanh %135 : vector<8x32xf32>
    %cst_60 = arith.constant 5.000000e-01 : f32
    %137 = vector.broadcast %cst_60 : f32 to vector<8x32xf32>
    %138 = arith.mulf %137, %136 : vector<8x32xf32>
    %cst_61 = arith.constant 5.000000e-01 : f32
    %139 = vector.broadcast %cst_61 : f32 to vector<8x32xf32>
    %140 = arith.addf %138, %139 : vector<8x32xf32>
    %141 = arith.addf %127, %131 : vector<8x32xf32>
    %cst_62 = arith.constant 5.000000e-01 : f32
    %142 = vector.broadcast %cst_62 : f32 to vector<8x32xf32>
    %143 = arith.mulf %142, %141 : vector<8x32xf32>
    %144 = math.tanh %143 : vector<8x32xf32>
    %cst_63 = arith.constant 5.000000e-01 : f32
    %145 = vector.broadcast %cst_63 : f32 to vector<8x32xf32>
    %146 = arith.mulf %145, %144 : vector<8x32xf32>
    %cst_64 = arith.constant 5.000000e-01 : f32
    %147 = vector.broadcast %cst_64 : f32 to vector<8x32xf32>
    %148 = arith.addf %146, %147 : vector<8x32xf32>
    %149 = arith.addf %132, %28 : vector<8x32xf32>
    %150 = arith.mulf %140, %149 : vector<8x32xf32>
    %151 = arith.addf %128, %150 : vector<8x32xf32>
    %152 = math.tanh %151 : vector<8x32xf32>
    %cst_65 = arith.constant 1.000000e+00 : f32
    %153 = vector.broadcast %cst_65 : f32 to vector<8x32xf32>
    %154 = arith.subf %153, %148 : vector<8x32xf32>
    %155 = arith.mulf %154, %152 : vector<8x32xf32>
    %156 = arith.mulf %148, %125 : vector<8x32xf32>
    %157 = arith.addf %155, %156 : vector<8x32xf32>
    %158 = vector.extract_strided_slice %12 {offsets = [32, 0], sizes = [8, 32], strides = [1, 1]} : vector<96x32xf32> to vector<8x32xf32>
    %159 = vector.extract_strided_slice %17 {offsets = [32, 0], sizes = [8, 32], strides = [1, 1]} : vector<96x32xf32> to vector<8x32xf32>
    %160 = vector.extract_strided_slice %22 {offsets = [32, 0], sizes = [8, 32], strides = [1, 1]} : vector<96x32xf32> to vector<8x32xf32>
    %161 = arith.truncf %157 : vector<8x32xf32> to vector<8x32xbf16>
    %cst_66 = arith.constant dense<0.000000e+00> : vector<8x32xf32>
    %162 = tpu.matmul %161, %23, %cst_66 {dimension_numbers = #tpu.dot_dimension_numbers<[1], [0], [0], [1], [0, 0, 1, 1], [], []>} : vector<8x32xbf16>, vector<32x32xbf16>, vector<8x32xf32> -> vector<8x32xf32>
    %cst_67 = arith.constant dense<0.000000e+00> : vector<8x32xf32>
    %163 = tpu.matmul %161, %24, %cst_67 {dimension_numbers = #tpu.dot_dimension_numbers<[1], [0], [0], [1], [0, 0, 1, 1], [], []>} : vector<8x32xbf16>, vector<32x32xbf16>, vector<8x32xf32> -> vector<8x32xf32>
    %cst_68 = arith.constant dense<0.000000e+00> : vector<8x32xf32>
    %164 = tpu.matmul %161, %25, %cst_68 {dimension_numbers = #tpu.dot_dimension_numbers<[1], [0], [0], [1], [0, 0, 1, 1], [], []>} : vector<8x32xbf16>, vector<32x32xbf16>, vector<8x32xf32> -> vector<8x32xf32>
    %165 = arith.addf %158, %162 : vector<8x32xf32>
    %cst_69 = arith.constant 5.000000e-01 : f32
    %166 = vector.broadcast %cst_69 : f32 to vector<8x32xf32>
    %167 = arith.mulf %166, %165 : vector<8x32xf32>
    %168 = math.tanh %167 : vector<8x32xf32>
    %cst_70 = arith.constant 5.000000e-01 : f32
    %169 = vector.broadcast %cst_70 : f32 to vector<8x32xf32>
    %170 = arith.mulf %169, %168 : vector<8x32xf32>
    %cst_71 = arith.constant 5.000000e-01 : f32
    %171 = vector.broadcast %cst_71 : f32 to vector<8x32xf32>
    %172 = arith.addf %170, %171 : vector<8x32xf32>
    %173 = arith.addf %159, %163 : vector<8x32xf32>
    %cst_72 = arith.constant 5.000000e-01 : f32
    %174 = vector.broadcast %cst_72 : f32 to vector<8x32xf32>
    %175 = arith.mulf %174, %173 : vector<8x32xf32>
    %176 = math.tanh %175 : vector<8x32xf32>
    %cst_73 = arith.constant 5.000000e-01 : f32
    %177 = vector.broadcast %cst_73 : f32 to vector<8x32xf32>
    %178 = arith.mulf %177, %176 : vector<8x32xf32>
    %cst_74 = arith.constant 5.000000e-01 : f32
    %179 = vector.broadcast %cst_74 : f32 to vector<8x32xf32>
    %180 = arith.addf %178, %179 : vector<8x32xf32>
    %181 = arith.addf %164, %28 : vector<8x32xf32>
    %182 = arith.mulf %172, %181 : vector<8x32xf32>
    %183 = arith.addf %160, %182 : vector<8x32xf32>
    %184 = math.tanh %183 : vector<8x32xf32>
    %cst_75 = arith.constant 1.000000e+00 : f32
    %185 = vector.broadcast %cst_75 : f32 to vector<8x32xf32>
    %186 = arith.subf %185, %180 : vector<8x32xf32>
    %187 = arith.mulf %186, %184 : vector<8x32xf32>
    %188 = arith.mulf %180, %157 : vector<8x32xf32>
    %189 = arith.addf %187, %188 : vector<8x32xf32>
    %190 = vector.extract_strided_slice %12 {offsets = [40, 0], sizes = [8, 32], strides = [1, 1]} : vector<96x32xf32> to vector<8x32xf32>
    %191 = vector.extract_strided_slice %17 {offsets = [40, 0], sizes = [8, 32], strides = [1, 1]} : vector<96x32xf32> to vector<8x32xf32>
    %192 = vector.extract_strided_slice %22 {offsets = [40, 0], sizes = [8, 32], strides = [1, 1]} : vector<96x32xf32> to vector<8x32xf32>
    %193 = arith.truncf %189 : vector<8x32xf32> to vector<8x32xbf16>
    %cst_76 = arith.constant dense<0.000000e+00> : vector<8x32xf32>
    %194 = tpu.matmul %193, %23, %cst_76 {dimension_numbers = #tpu.dot_dimension_numbers<[1], [0], [0], [1], [0, 0, 1, 1], [], []>} : vector<8x32xbf16>, vector<32x32xbf16>, vector<8x32xf32> -> vector<8x32xf32>
    %cst_77 = arith.constant dense<0.000000e+00> : vector<8x32xf32>
    %195 = tpu.matmul %193, %24, %cst_77 {dimension_numbers = #tpu.dot_dimension_numbers<[1], [0], [0], [1], [0, 0, 1, 1], [], []>} : vector<8x32xbf16>, vector<32x32xbf16>, vector<8x32xf32> -> vector<8x32xf32>
    %cst_78 = arith.constant dense<0.000000e+00> : vector<8x32xf32>
    %196 = tpu.matmul %193, %25, %cst_78 {dimension_numbers = #tpu.dot_dimension_numbers<[1], [0], [0], [1], [0, 0, 1, 1], [], []>} : vector<8x32xbf16>, vector<32x32xbf16>, vector<8x32xf32> -> vector<8x32xf32>
    %197 = arith.addf %190, %194 : vector<8x32xf32>
    %cst_79 = arith.constant 5.000000e-01 : f32
    %198 = vector.broadcast %cst_79 : f32 to vector<8x32xf32>
    %199 = arith.mulf %198, %197 : vector<8x32xf32>
    %200 = math.tanh %199 : vector<8x32xf32>
    %cst_80 = arith.constant 5.000000e-01 : f32
    %201 = vector.broadcast %cst_80 : f32 to vector<8x32xf32>
    %202 = arith.mulf %201, %200 : vector<8x32xf32>
    %cst_81 = arith.constant 5.000000e-01 : f32
    %203 = vector.broadcast %cst_81 : f32 to vector<8x32xf32>
    %204 = arith.addf %202, %203 : vector<8x32xf32>
    %205 = arith.addf %191, %195 : vector<8x32xf32>
    %cst_82 = arith.constant 5.000000e-01 : f32
    %206 = vector.broadcast %cst_82 : f32 to vector<8x32xf32>
    %207 = arith.mulf %206, %205 : vector<8x32xf32>
    %208 = math.tanh %207 : vector<8x32xf32>
    %cst_83 = arith.constant 5.000000e-01 : f32
    %209 = vector.broadcast %cst_83 : f32 to vector<8x32xf32>
    %210 = arith.mulf %209, %208 : vector<8x32xf32>
    %cst_84 = arith.constant 5.000000e-01 : f32
    %211 = vector.broadcast %cst_84 : f32 to vector<8x32xf32>
    %212 = arith.addf %210, %211 : vector<8x32xf32>
    %213 = arith.addf %196, %28 : vector<8x32xf32>
    %214 = arith.mulf %204, %213 : vector<8x32xf32>
    %215 = arith.addf %192, %214 : vector<8x32xf32>
    %216 = math.tanh %215 : vector<8x32xf32>
    %cst_85 = arith.constant 1.000000e+00 : f32
    %217 = vector.broadcast %cst_85 : f32 to vector<8x32xf32>
    %218 = arith.subf %217, %212 : vector<8x32xf32>
    %219 = arith.mulf %218, %216 : vector<8x32xf32>
    %220 = arith.mulf %212, %189 : vector<8x32xf32>
    %221 = arith.addf %219, %220 : vector<8x32xf32>
    %222 = vector.extract_strided_slice %12 {offsets = [48, 0], sizes = [8, 32], strides = [1, 1]} : vector<96x32xf32> to vector<8x32xf32>
    %223 = vector.extract_strided_slice %17 {offsets = [48, 0], sizes = [8, 32], strides = [1, 1]} : vector<96x32xf32> to vector<8x32xf32>
    %224 = vector.extract_strided_slice %22 {offsets = [48, 0], sizes = [8, 32], strides = [1, 1]} : vector<96x32xf32> to vector<8x32xf32>
    %225 = arith.truncf %221 : vector<8x32xf32> to vector<8x32xbf16>
    %cst_86 = arith.constant dense<0.000000e+00> : vector<8x32xf32>
    %226 = tpu.matmul %225, %23, %cst_86 {dimension_numbers = #tpu.dot_dimension_numbers<[1], [0], [0], [1], [0, 0, 1, 1], [], []>} : vector<8x32xbf16>, vector<32x32xbf16>, vector<8x32xf32> -> vector<8x32xf32>
    %cst_87 = arith.constant dense<0.000000e+00> : vector<8x32xf32>
    %227 = tpu.matmul %225, %24, %cst_87 {dimension_numbers = #tpu.dot_dimension_numbers<[1], [0], [0], [1], [0, 0, 1, 1], [], []>} : vector<8x32xbf16>, vector<32x32xbf16>, vector<8x32xf32> -> vector<8x32xf32>
    %cst_88 = arith.constant dense<0.000000e+00> : vector<8x32xf32>
    %228 = tpu.matmul %225, %25, %cst_88 {dimension_numbers = #tpu.dot_dimension_numbers<[1], [0], [0], [1], [0, 0, 1, 1], [], []>} : vector<8x32xbf16>, vector<32x32xbf16>, vector<8x32xf32> -> vector<8x32xf32>
    %229 = arith.addf %222, %226 : vector<8x32xf32>
    %cst_89 = arith.constant 5.000000e-01 : f32
    %230 = vector.broadcast %cst_89 : f32 to vector<8x32xf32>
    %231 = arith.mulf %230, %229 : vector<8x32xf32>
    %232 = math.tanh %231 : vector<8x32xf32>
    %cst_90 = arith.constant 5.000000e-01 : f32
    %233 = vector.broadcast %cst_90 : f32 to vector<8x32xf32>
    %234 = arith.mulf %233, %232 : vector<8x32xf32>
    %cst_91 = arith.constant 5.000000e-01 : f32
    %235 = vector.broadcast %cst_91 : f32 to vector<8x32xf32>
    %236 = arith.addf %234, %235 : vector<8x32xf32>
    %237 = arith.addf %223, %227 : vector<8x32xf32>
    %cst_92 = arith.constant 5.000000e-01 : f32
    %238 = vector.broadcast %cst_92 : f32 to vector<8x32xf32>
    %239 = arith.mulf %238, %237 : vector<8x32xf32>
    %240 = math.tanh %239 : vector<8x32xf32>
    %cst_93 = arith.constant 5.000000e-01 : f32
    %241 = vector.broadcast %cst_93 : f32 to vector<8x32xf32>
    %242 = arith.mulf %241, %240 : vector<8x32xf32>
    %cst_94 = arith.constant 5.000000e-01 : f32
    %243 = vector.broadcast %cst_94 : f32 to vector<8x32xf32>
    %244 = arith.addf %242, %243 : vector<8x32xf32>
    %245 = arith.addf %228, %28 : vector<8x32xf32>
    %246 = arith.mulf %236, %245 : vector<8x32xf32>
    %247 = arith.addf %224, %246 : vector<8x32xf32>
    %248 = math.tanh %247 : vector<8x32xf32>
    %cst_95 = arith.constant 1.000000e+00 : f32
    %249 = vector.broadcast %cst_95 : f32 to vector<8x32xf32>
    %250 = arith.subf %249, %244 : vector<8x32xf32>
    %251 = arith.mulf %250, %248 : vector<8x32xf32>
    %252 = arith.mulf %244, %221 : vector<8x32xf32>
    %253 = arith.addf %251, %252 : vector<8x32xf32>
    %254 = vector.extract_strided_slice %12 {offsets = [56, 0], sizes = [8, 32], strides = [1, 1]} : vector<96x32xf32> to vector<8x32xf32>
    %255 = vector.extract_strided_slice %17 {offsets = [56, 0], sizes = [8, 32], strides = [1, 1]} : vector<96x32xf32> to vector<8x32xf32>
    %256 = vector.extract_strided_slice %22 {offsets = [56, 0], sizes = [8, 32], strides = [1, 1]} : vector<96x32xf32> to vector<8x32xf32>
    %257 = arith.truncf %253 : vector<8x32xf32> to vector<8x32xbf16>
    %cst_96 = arith.constant dense<0.000000e+00> : vector<8x32xf32>
    %258 = tpu.matmul %257, %23, %cst_96 {dimension_numbers = #tpu.dot_dimension_numbers<[1], [0], [0], [1], [0, 0, 1, 1], [], []>} : vector<8x32xbf16>, vector<32x32xbf16>, vector<8x32xf32> -> vector<8x32xf32>
    %cst_97 = arith.constant dense<0.000000e+00> : vector<8x32xf32>
    %259 = tpu.matmul %257, %24, %cst_97 {dimension_numbers = #tpu.dot_dimension_numbers<[1], [0], [0], [1], [0, 0, 1, 1], [], []>} : vector<8x32xbf16>, vector<32x32xbf16>, vector<8x32xf32> -> vector<8x32xf32>
    %cst_98 = arith.constant dense<0.000000e+00> : vector<8x32xf32>
    %260 = tpu.matmul %257, %25, %cst_98 {dimension_numbers = #tpu.dot_dimension_numbers<[1], [0], [0], [1], [0, 0, 1, 1], [], []>} : vector<8x32xbf16>, vector<32x32xbf16>, vector<8x32xf32> -> vector<8x32xf32>
    %261 = arith.addf %254, %258 : vector<8x32xf32>
    %cst_99 = arith.constant 5.000000e-01 : f32
    %262 = vector.broadcast %cst_99 : f32 to vector<8x32xf32>
    %263 = arith.mulf %262, %261 : vector<8x32xf32>
    %264 = math.tanh %263 : vector<8x32xf32>
    %cst_100 = arith.constant 5.000000e-01 : f32
    %265 = vector.broadcast %cst_100 : f32 to vector<8x32xf32>
    %266 = arith.mulf %265, %264 : vector<8x32xf32>
    %cst_101 = arith.constant 5.000000e-01 : f32
    %267 = vector.broadcast %cst_101 : f32 to vector<8x32xf32>
    %268 = arith.addf %266, %267 : vector<8x32xf32>
    %269 = arith.addf %255, %259 : vector<8x32xf32>
    %cst_102 = arith.constant 5.000000e-01 : f32
    %270 = vector.broadcast %cst_102 : f32 to vector<8x32xf32>
    %271 = arith.mulf %270, %269 : vector<8x32xf32>
    %272 = math.tanh %271 : vector<8x32xf32>
    %cst_103 = arith.constant 5.000000e-01 : f32
    %273 = vector.broadcast %cst_103 : f32 to vector<8x32xf32>
    %274 = arith.mulf %273, %272 : vector<8x32xf32>
    %cst_104 = arith.constant 5.000000e-01 : f32
    %275 = vector.broadcast %cst_104 : f32 to vector<8x32xf32>
    %276 = arith.addf %274, %275 : vector<8x32xf32>
    %277 = arith.addf %260, %28 : vector<8x32xf32>
    %278 = arith.mulf %268, %277 : vector<8x32xf32>
    %279 = arith.addf %256, %278 : vector<8x32xf32>
    %280 = math.tanh %279 : vector<8x32xf32>
    %cst_105 = arith.constant 1.000000e+00 : f32
    %281 = vector.broadcast %cst_105 : f32 to vector<8x32xf32>
    %282 = arith.subf %281, %276 : vector<8x32xf32>
    %283 = arith.mulf %282, %280 : vector<8x32xf32>
    %284 = arith.mulf %276, %253 : vector<8x32xf32>
    %285 = arith.addf %283, %284 : vector<8x32xf32>
    %286 = vector.extract_strided_slice %12 {offsets = [64, 0], sizes = [8, 32], strides = [1, 1]} : vector<96x32xf32> to vector<8x32xf32>
    %287 = vector.extract_strided_slice %17 {offsets = [64, 0], sizes = [8, 32], strides = [1, 1]} : vector<96x32xf32> to vector<8x32xf32>
    %288 = vector.extract_strided_slice %22 {offsets = [64, 0], sizes = [8, 32], strides = [1, 1]} : vector<96x32xf32> to vector<8x32xf32>
    %289 = arith.truncf %285 : vector<8x32xf32> to vector<8x32xbf16>
    %cst_106 = arith.constant dense<0.000000e+00> : vector<8x32xf32>
    %290 = tpu.matmul %289, %23, %cst_106 {dimension_numbers = #tpu.dot_dimension_numbers<[1], [0], [0], [1], [0, 0, 1, 1], [], []>} : vector<8x32xbf16>, vector<32x32xbf16>, vector<8x32xf32> -> vector<8x32xf32>
    %cst_107 = arith.constant dense<0.000000e+00> : vector<8x32xf32>
    %291 = tpu.matmul %289, %24, %cst_107 {dimension_numbers = #tpu.dot_dimension_numbers<[1], [0], [0], [1], [0, 0, 1, 1], [], []>} : vector<8x32xbf16>, vector<32x32xbf16>, vector<8x32xf32> -> vector<8x32xf32>
    %cst_108 = arith.constant dense<0.000000e+00> : vector<8x32xf32>
    %292 = tpu.matmul %289, %25, %cst_108 {dimension_numbers = #tpu.dot_dimension_numbers<[1], [0], [0], [1], [0, 0, 1, 1], [], []>} : vector<8x32xbf16>, vector<32x32xbf16>, vector<8x32xf32> -> vector<8x32xf32>
    %293 = arith.addf %286, %290 : vector<8x32xf32>
    %cst_109 = arith.constant 5.000000e-01 : f32
    %294 = vector.broadcast %cst_109 : f32 to vector<8x32xf32>
    %295 = arith.mulf %294, %293 : vector<8x32xf32>
    %296 = math.tanh %295 : vector<8x32xf32>
    %cst_110 = arith.constant 5.000000e-01 : f32
    %297 = vector.broadcast %cst_110 : f32 to vector<8x32xf32>
    %298 = arith.mulf %297, %296 : vector<8x32xf32>
    %cst_111 = arith.constant 5.000000e-01 : f32
    %299 = vector.broadcast %cst_111 : f32 to vector<8x32xf32>
    %300 = arith.addf %298, %299 : vector<8x32xf32>
    %301 = arith.addf %287, %291 : vector<8x32xf32>
    %cst_112 = arith.constant 5.000000e-01 : f32
    %302 = vector.broadcast %cst_112 : f32 to vector<8x32xf32>
    %303 = arith.mulf %302, %301 : vector<8x32xf32>
    %304 = math.tanh %303 : vector<8x32xf32>
    %cst_113 = arith.constant 5.000000e-01 : f32
    %305 = vector.broadcast %cst_113 : f32 to vector<8x32xf32>
    %306 = arith.mulf %305, %304 : vector<8x32xf32>
    %cst_114 = arith.constant 5.000000e-01 : f32
    %307 = vector.broadcast %cst_114 : f32 to vector<8x32xf32>
    %308 = arith.addf %306, %307 : vector<8x32xf32>
    %309 = arith.addf %292, %28 : vector<8x32xf32>
    %310 = arith.mulf %300, %309 : vector<8x32xf32>
    %311 = arith.addf %288, %310 : vector<8x32xf32>
    %312 = math.tanh %311 : vector<8x32xf32>
    %cst_115 = arith.constant 1.000000e+00 : f32
    %313 = vector.broadcast %cst_115 : f32 to vector<8x32xf32>
    %314 = arith.subf %313, %308 : vector<8x32xf32>
    %315 = arith.mulf %314, %312 : vector<8x32xf32>
    %316 = arith.mulf %308, %285 : vector<8x32xf32>
    %317 = arith.addf %315, %316 : vector<8x32xf32>
    %318 = vector.extract_strided_slice %12 {offsets = [72, 0], sizes = [8, 32], strides = [1, 1]} : vector<96x32xf32> to vector<8x32xf32>
    %319 = vector.extract_strided_slice %17 {offsets = [72, 0], sizes = [8, 32], strides = [1, 1]} : vector<96x32xf32> to vector<8x32xf32>
    %320 = vector.extract_strided_slice %22 {offsets = [72, 0], sizes = [8, 32], strides = [1, 1]} : vector<96x32xf32> to vector<8x32xf32>
    %321 = arith.truncf %317 : vector<8x32xf32> to vector<8x32xbf16>
    %cst_116 = arith.constant dense<0.000000e+00> : vector<8x32xf32>
    %322 = tpu.matmul %321, %23, %cst_116 {dimension_numbers = #tpu.dot_dimension_numbers<[1], [0], [0], [1], [0, 0, 1, 1], [], []>} : vector<8x32xbf16>, vector<32x32xbf16>, vector<8x32xf32> -> vector<8x32xf32>
    %cst_117 = arith.constant dense<0.000000e+00> : vector<8x32xf32>
    %323 = tpu.matmul %321, %24, %cst_117 {dimension_numbers = #tpu.dot_dimension_numbers<[1], [0], [0], [1], [0, 0, 1, 1], [], []>} : vector<8x32xbf16>, vector<32x32xbf16>, vector<8x32xf32> -> vector<8x32xf32>
    %cst_118 = arith.constant dense<0.000000e+00> : vector<8x32xf32>
    %324 = tpu.matmul %321, %25, %cst_118 {dimension_numbers = #tpu.dot_dimension_numbers<[1], [0], [0], [1], [0, 0, 1, 1], [], []>} : vector<8x32xbf16>, vector<32x32xbf16>, vector<8x32xf32> -> vector<8x32xf32>
    %325 = arith.addf %318, %322 : vector<8x32xf32>
    %cst_119 = arith.constant 5.000000e-01 : f32
    %326 = vector.broadcast %cst_119 : f32 to vector<8x32xf32>
    %327 = arith.mulf %326, %325 : vector<8x32xf32>
    %328 = math.tanh %327 : vector<8x32xf32>
    %cst_120 = arith.constant 5.000000e-01 : f32
    %329 = vector.broadcast %cst_120 : f32 to vector<8x32xf32>
    %330 = arith.mulf %329, %328 : vector<8x32xf32>
    %cst_121 = arith.constant 5.000000e-01 : f32
    %331 = vector.broadcast %cst_121 : f32 to vector<8x32xf32>
    %332 = arith.addf %330, %331 : vector<8x32xf32>
    %333 = arith.addf %319, %323 : vector<8x32xf32>
    %cst_122 = arith.constant 5.000000e-01 : f32
    %334 = vector.broadcast %cst_122 : f32 to vector<8x32xf32>
    %335 = arith.mulf %334, %333 : vector<8x32xf32>
    %336 = math.tanh %335 : vector<8x32xf32>
    %cst_123 = arith.constant 5.000000e-01 : f32
    %337 = vector.broadcast %cst_123 : f32 to vector<8x32xf32>
    %338 = arith.mulf %337, %336 : vector<8x32xf32>
    %cst_124 = arith.constant 5.000000e-01 : f32
    %339 = vector.broadcast %cst_124 : f32 to vector<8x32xf32>
    %340 = arith.addf %338, %339 : vector<8x32xf32>
    %341 = arith.addf %324, %28 : vector<8x32xf32>
    %342 = arith.mulf %332, %341 : vector<8x32xf32>
    %343 = arith.addf %320, %342 : vector<8x32xf32>
    %344 = math.tanh %343 : vector<8x32xf32>
    %cst_125 = arith.constant 1.000000e+00 : f32
    %345 = vector.broadcast %cst_125 : f32 to vector<8x32xf32>
    %346 = arith.subf %345, %340 : vector<8x32xf32>
    %347 = arith.mulf %346, %344 : vector<8x32xf32>
    %348 = arith.mulf %340, %317 : vector<8x32xf32>
    %349 = arith.addf %347, %348 : vector<8x32xf32>
    %350 = vector.extract_strided_slice %12 {offsets = [80, 0], sizes = [8, 32], strides = [1, 1]} : vector<96x32xf32> to vector<8x32xf32>
    %351 = vector.extract_strided_slice %17 {offsets = [80, 0], sizes = [8, 32], strides = [1, 1]} : vector<96x32xf32> to vector<8x32xf32>
    %352 = vector.extract_strided_slice %22 {offsets = [80, 0], sizes = [8, 32], strides = [1, 1]} : vector<96x32xf32> to vector<8x32xf32>
    %353 = arith.truncf %349 : vector<8x32xf32> to vector<8x32xbf16>
    %cst_126 = arith.constant dense<0.000000e+00> : vector<8x32xf32>
    %354 = tpu.matmul %353, %23, %cst_126 {dimension_numbers = #tpu.dot_dimension_numbers<[1], [0], [0], [1], [0, 0, 1, 1], [], []>} : vector<8x32xbf16>, vector<32x32xbf16>, vector<8x32xf32> -> vector<8x32xf32>
    %cst_127 = arith.constant dense<0.000000e+00> : vector<8x32xf32>
    %355 = tpu.matmul %353, %24, %cst_127 {dimension_numbers = #tpu.dot_dimension_numbers<[1], [0], [0], [1], [0, 0, 1, 1], [], []>} : vector<8x32xbf16>, vector<32x32xbf16>, vector<8x32xf32> -> vector<8x32xf32>
    %cst_128 = arith.constant dense<0.000000e+00> : vector<8x32xf32>
    %356 = tpu.matmul %353, %25, %cst_128 {dimension_numbers = #tpu.dot_dimension_numbers<[1], [0], [0], [1], [0, 0, 1, 1], [], []>} : vector<8x32xbf16>, vector<32x32xbf16>, vector<8x32xf32> -> vector<8x32xf32>
    %357 = arith.addf %350, %354 : vector<8x32xf32>
    %cst_129 = arith.constant 5.000000e-01 : f32
    %358 = vector.broadcast %cst_129 : f32 to vector<8x32xf32>
    %359 = arith.mulf %358, %357 : vector<8x32xf32>
    %360 = math.tanh %359 : vector<8x32xf32>
    %cst_130 = arith.constant 5.000000e-01 : f32
    %361 = vector.broadcast %cst_130 : f32 to vector<8x32xf32>
    %362 = arith.mulf %361, %360 : vector<8x32xf32>
    %cst_131 = arith.constant 5.000000e-01 : f32
    %363 = vector.broadcast %cst_131 : f32 to vector<8x32xf32>
    %364 = arith.addf %362, %363 : vector<8x32xf32>
    %365 = arith.addf %351, %355 : vector<8x32xf32>
    %cst_132 = arith.constant 5.000000e-01 : f32
    %366 = vector.broadcast %cst_132 : f32 to vector<8x32xf32>
    %367 = arith.mulf %366, %365 : vector<8x32xf32>
    %368 = math.tanh %367 : vector<8x32xf32>
    %cst_133 = arith.constant 5.000000e-01 : f32
    %369 = vector.broadcast %cst_133 : f32 to vector<8x32xf32>
    %370 = arith.mulf %369, %368 : vector<8x32xf32>
    %cst_134 = arith.constant 5.000000e-01 : f32
    %371 = vector.broadcast %cst_134 : f32 to vector<8x32xf32>
    %372 = arith.addf %370, %371 : vector<8x32xf32>
    %373 = arith.addf %356, %28 : vector<8x32xf32>
    %374 = arith.mulf %364, %373 : vector<8x32xf32>
    %375 = arith.addf %352, %374 : vector<8x32xf32>
    %376 = math.tanh %375 : vector<8x32xf32>
    %cst_135 = arith.constant 1.000000e+00 : f32
    %377 = vector.broadcast %cst_135 : f32 to vector<8x32xf32>
    %378 = arith.subf %377, %372 : vector<8x32xf32>
    %379 = arith.mulf %378, %376 : vector<8x32xf32>
    %380 = arith.mulf %372, %349 : vector<8x32xf32>
    %381 = arith.addf %379, %380 : vector<8x32xf32>
    %382 = vector.extract_strided_slice %12 {offsets = [88, 0], sizes = [8, 32], strides = [1, 1]} : vector<96x32xf32> to vector<8x32xf32>
    %383 = vector.extract_strided_slice %17 {offsets = [88, 0], sizes = [8, 32], strides = [1, 1]} : vector<96x32xf32> to vector<8x32xf32>
    %384 = vector.extract_strided_slice %22 {offsets = [88, 0], sizes = [8, 32], strides = [1, 1]} : vector<96x32xf32> to vector<8x32xf32>
    %385 = arith.truncf %381 : vector<8x32xf32> to vector<8x32xbf16>
    %cst_136 = arith.constant dense<0.000000e+00> : vector<8x32xf32>
    %386 = tpu.matmul %385, %23, %cst_136 {dimension_numbers = #tpu.dot_dimension_numbers<[1], [0], [0], [1], [0, 0, 1, 1], [], []>} : vector<8x32xbf16>, vector<32x32xbf16>, vector<8x32xf32> -> vector<8x32xf32>
    %cst_137 = arith.constant dense<0.000000e+00> : vector<8x32xf32>
    %387 = tpu.matmul %385, %24, %cst_137 {dimension_numbers = #tpu.dot_dimension_numbers<[1], [0], [0], [1], [0, 0, 1, 1], [], []>} : vector<8x32xbf16>, vector<32x32xbf16>, vector<8x32xf32> -> vector<8x32xf32>
    %cst_138 = arith.constant dense<0.000000e+00> : vector<8x32xf32>
    %388 = tpu.matmul %385, %25, %cst_138 {dimension_numbers = #tpu.dot_dimension_numbers<[1], [0], [0], [1], [0, 0, 1, 1], [], []>} : vector<8x32xbf16>, vector<32x32xbf16>, vector<8x32xf32> -> vector<8x32xf32>
    %389 = arith.addf %382, %386 : vector<8x32xf32>
    %cst_139 = arith.constant 5.000000e-01 : f32
    %390 = vector.broadcast %cst_139 : f32 to vector<8x32xf32>
    %391 = arith.mulf %390, %389 : vector<8x32xf32>
    %392 = math.tanh %391 : vector<8x32xf32>
    %cst_140 = arith.constant 5.000000e-01 : f32
    %393 = vector.broadcast %cst_140 : f32 to vector<8x32xf32>
    %394 = arith.mulf %393, %392 : vector<8x32xf32>
    %cst_141 = arith.constant 5.000000e-01 : f32
    %395 = vector.broadcast %cst_141 : f32 to vector<8x32xf32>
    %396 = arith.addf %394, %395 : vector<8x32xf32>
    %397 = arith.addf %383, %387 : vector<8x32xf32>
    %cst_142 = arith.constant 5.000000e-01 : f32
    %398 = vector.broadcast %cst_142 : f32 to vector<8x32xf32>
    %399 = arith.mulf %398, %397 : vector<8x32xf32>
    %400 = math.tanh %399 : vector<8x32xf32>
    %cst_143 = arith.constant 5.000000e-01 : f32
    %401 = vector.broadcast %cst_143 : f32 to vector<8x32xf32>
    %402 = arith.mulf %401, %400 : vector<8x32xf32>
    %cst_144 = arith.constant 5.000000e-01 : f32
    %403 = vector.broadcast %cst_144 : f32 to vector<8x32xf32>
    %404 = arith.addf %402, %403 : vector<8x32xf32>
    %405 = arith.addf %388, %28 : vector<8x32xf32>
    %406 = arith.mulf %396, %405 : vector<8x32xf32>
    %407 = arith.addf %384, %406 : vector<8x32xf32>
    %408 = math.tanh %407 : vector<8x32xf32>
    %cst_145 = arith.constant 1.000000e+00 : f32
    %409 = vector.broadcast %cst_145 : f32 to vector<8x32xf32>
    %410 = arith.subf %409, %404 : vector<8x32xf32>
    %411 = arith.mulf %410, %408 : vector<8x32xf32>
    %412 = arith.mulf %404, %381 : vector<8x32xf32>
    %413 = arith.addf %411, %412 : vector<8x32xf32>
    %414 = arith.truncf %413 : vector<8x32xf32> to vector<8x32xbf16>
    %c0_146 = arith.constant 0 : index
    %c0_147 = arith.constant 0 : index
    %415 = vector.load %arg11[%c0_146, %c0_147] : memref<32x64xbf16, #tpu.memory_space<vmem>>, vector<32x64xbf16>
    %cst_148 = arith.constant dense<0.000000e+00> : vector<8x64xf32>
    %416 = tpu.matmul %414, %415, %cst_148 {dimension_numbers = #tpu.dot_dimension_numbers<[1], [0], [0], [1], [0, 0, 1, 1], [], []>} : vector<8x32xbf16>, vector<32x64xbf16>, vector<8x64xf32> -> vector<8x64xf32>
    %c0_149 = arith.constant 0 : index
    %c0_150 = arith.constant 0 : index
    %417 = vector.load %arg12[%c0_149, %c0_150] : memref<1x64xf32, #tpu.memory_space<vmem>>, vector<1x64xf32>
    %418 = vector.broadcast %417 : vector<1x64xf32> to vector<8x64xf32>
    %419 = arith.addf %416, %418 : vector<8x64xf32>
    %cst_151 = arith.constant 0.000000e+00 : f32
    %420 = vector.broadcast %cst_151 : f32 to vector<8x64xf32>
    %421 = arith.maximumf %419, %420 : vector<8x64xf32>
    %422 = arith.truncf %421 : vector<8x64xf32> to vector<8x64xbf16>
    %c0_152 = arith.constant 0 : index
    %c0_153 = arith.constant 0 : index
    %423 = vector.load %arg13[%c0_152, %c0_153] : memref<64x64xbf16, #tpu.memory_space<vmem>>, vector<64x64xbf16>
    %cst_154 = arith.constant dense<0.000000e+00> : vector<8x64xf32>
    %424 = tpu.matmul %422, %423, %cst_154 {dimension_numbers = #tpu.dot_dimension_numbers<[1], [0], [0], [1], [0, 0, 1, 1], [], []>} : vector<8x64xbf16>, vector<64x64xbf16>, vector<8x64xf32> -> vector<8x64xf32>
    %c0_155 = arith.constant 0 : index
    %c0_156 = arith.constant 0 : index
    %425 = vector.load %arg14[%c0_155, %c0_156] : memref<1x64xf32, #tpu.memory_space<vmem>>, vector<1x64xf32>
    %426 = vector.broadcast %425 : vector<1x64xf32> to vector<8x64xf32>
    %427 = arith.addf %424, %426 : vector<8x64xf32>
    %428 = arith.truncf %427 : vector<8x64xf32> to vector<8x64xbf16>
    %c0_157 = arith.constant 0 : index
    %c0_158 = arith.constant 0 : index
    %429 = vector.load %arg15[%c0_157, %c0_158] : memref<64x5xbf16, #tpu.memory_space<vmem>>, vector<64x5xbf16>
    %cst_159 = arith.constant dense<0.000000e+00> : vector<8x5xf32>
    %430 = tpu.matmul %428, %429, %cst_159 {dimension_numbers = #tpu.dot_dimension_numbers<[1], [0], [0], [1], [0, 0, 1, 1], [], []>} : vector<8x64xbf16>, vector<64x5xbf16>, vector<8x5xf32> -> vector<8x5xf32>
    %c0_160 = arith.constant 0 : index
    %c0_161 = arith.constant 0 : index
    %431 = vector.load %arg16[%c0_160, %c0_161] : memref<1x5xf32, #tpu.memory_space<vmem>>, vector<1x5xf32>
    %432 = vector.broadcast %431 : vector<1x5xf32> to vector<8x5xf32>
    %433 = arith.addf %430, %432 : vector<8x5xf32>
    %cst_162 = arith.constant dense<0xFF800000> : vector<8xf32>
    %434 = vector.multi_reduction <maximumf>, %433, %cst_162 [1] : vector<8x5xf32> to vector<8xf32>
    %435 = vector.shape_cast %434 : vector<8xf32> to vector<8x1xf32>
    %436 = vector.broadcast %435 : vector<8x1xf32> to vector<8x5xf32>
    %437 = arith.subf %433, %436 : vector<8x5xf32>
    %438 = math.exp %437 : vector<8x5xf32>
    %cst_163 = arith.constant dense<0.000000e+00> : vector<8xf32>
    %439 = vector.multi_reduction <add>, %438, %cst_163 [1] : vector<8x5xf32> to vector<8xf32>
    %440 = vector.shape_cast %439 : vector<8xf32> to vector<8x1xf32>
    %441 = math.log %440 : vector<8x1xf32>
    %442 = vector.broadcast %441 : vector<8x1xf32> to vector<8x5xf32>
    %443 = arith.subf %437, %442 : vector<8x5xf32>
    %c0_164 = arith.constant 0 : index
    %c0_165 = arith.constant 0 : index
    %444 = vector.load %arg17[%c0_164, %c0_165] : memref<8x5xf32, #tpu.memory_space<vmem>>, vector<8x5xf32>
    tpu.vector_store %arg17[%c0_164, %c0_165], %443 {strides = array<i32>} : memref<8x5xf32, #tpu.memory_space<vmem>>, vector<8x5xf32>,
    return
  }
}

</mosaic_0001>

<bundles_post_ra>
// kernel: _lambda_.1
= control target key start
LH: loop header
LB: loop body
LE: loop exit
PB: predicated region body
PF: predicated region fallthrough
CT: control target
= control target key end

     0   :  { %v3184_v0 = vmov 0   ;;  %vm178_vm0 = vcmask 1046528   ;;  %v3185_v15 = vmov 0.0   ;;  %v69_v21 = vlaneseq  ;;  %s3897_s0 = inlined_call_operand.vmem [shape: s32[96,1], index: 0, kind: input, shape index: {}]   ;;  %s3898_s2 = inlined_call_operand.vmem [shape: bf16[30,32], index: 2, kind: input, shape index: {}]   ;;  %s3899_s1 = inlined_call_operand.vmem [shape: bf16[30,32], index: 1, kind: input, shape index: {}]   ;;  %s3900_s8 = inlined_call_operand.vmem [shape: bf16[32,32], index: 8, kind: input, shape index: {}]   ;;  %s3901_s3 = inlined_call_operand.vmem [shape: bf16[30,32], index: 3, kind: input, shape index: {}]   ;;  %s3902_s9 = inlined_call_operand.vmem [shape: bf16[32,32], index: 9, kind: input, shape index: {}]   ;;  %s3903_s10 = inlined_call_operand.vmem [shape: bf16[32,32], index: 10, kind: input, shape index: {}]   ;;  %s3904_s4 = inlined_call_operand.vmem [shape: f32[1,32], index: 4, kind: input, shape index: {}]   ;;  %s3905_s5 = inlined_call_operand.vmem [shape: f32[1,32], index: 5, kind: input, shape index: {}]   ;;  %s3906_s6 = inlined_call_operand.vmem [shape: f32[1,32], index: 6, kind: input, shape index: {}]   ;;  %s3907_s7 = inlined_call_operand.vmem [shape: f32[1,32], index: 7, kind: input, shape index: {}]   ;;  %s3908_s11 = inlined_call_operand.vmem [shape: bf16[32,64], index: 11, kind: input, shape index: {}]   ;;  %s3909_s13 = inlined_call_operand.vmem [shape: bf16[64,64], index: 13, kind: input, shape index: {}]   ;;  %s3910_s15 = inlined_call_operand.vmem [shape: bf16[64,5], index: 15, kind: input, shape index: {}]   ;;  %s3911_s12 = inlined_call_operand.vmem [shape: f32[1,64], index: 12, kind: input, shape index: {}]   ;;  %s3912_s14 = inlined_call_operand.vmem [shape: f32[1,64], index: 14, kind: input, shape index: {}]   ;;  %s3913_s16 = inlined_call_operand.vmem [shape: f32[1,5], index: 16, kind: input, shape index: {}]   ;;  %s3914_s17 = inlined_call_operand.vmem [shape: f32[8,5], index: 17, kind: output, shape index: {}]  }
   0x1   :  { %3917 = sst [smem:[#allocation2_spill]] %s3897_s0  ;;  %3078 = vset.pattern.permute.xlu1 %v3184_v0  ;;  %3077 = vset.pattern.permute.xlu0 %v3184_v0  ;;  %v3080_v8 = vld [vmem:[%s3899_s1] sm:$0xff]   ;;  %v3082_v10 = vld [vmem:[%s3899_s1 + $0x8] sm:$0x7f]   ;;  %vm159_vm5 = vcmask 244736   ;;  %vm3186_vm14 = vmmov 0  }
   0x2   :  { %3918 = sst [smem:[#allocation3_spill]] %s3898_s2  ;;  %s3919_s26 = sld [smem:[#allocation2_spill]]  ;;  %2703 = vmatprep.subr.bf16.mxu0 %v3080_v8  ;;  %v180_v12 = vsel %vm178_vm0, %v3082_v10, 0  ;;  %v3085_v20 = vld [vmem:[%s3901_s3] sm:$0xff]   ;;  %v3335_v22 = vand.u32 127, %v69_v21  ;;  %v3365_v40 = vld [vmem:[%s3900_s8 + $0x8] sm:$0xff]  }
   0x3   :  { %s3920_s24 = sld [smem:[#allocation3_spill]]  ;;  %2704 = vmatpush3.bf16.msra.mxu0 %v3080_v8  ;;  %v3348_v33 = vld [vmem:[%s3900_s8] sm:$0xff]   ;;  %v3086_v36 = vld [vmem:[%s3901_s3 + $0x8] sm:$0x7f]   ;;  %vm506_vm15 = vcmask 261120  }
   0x4   :  { %3071 = vmatprep.subr.msk.bf16.mxu0 %vm178_vm0, %v3082_v10  ;;  %v392_v43 = vsel %vm178_vm0, %v3086_v36, 0  ;;  %v3399_v57 = vld [vmem:[%s3902_s9] sm:$0xff]   ;;  %v3408_v58 = vld [vmem:[%s3902_s9 + $0x8] sm:$0xff]  }
   0x5   :  { %v3419_v59 = vld [vmem:[%s3903_s10] sm:$0xff]   ;;  %v3430_v60 = vld [vmem:[%s3903_s10 + $0x8] sm:$0xff]  }
   0x6   :  { %v2475_v61 = vld [vmem:[%s3904_s4] ss:$0 sm:$0xff] }
   0x7   :  { %2706 = vmatpush3.bf16.msra.mxu0 %v180_v12  ;;  %v3454_v62 = vld [vmem:[%s3905_s5] ss:$0 sm:$0xff] }
   0x8   :  { %v59_v1 = vld [vmem:[%s3919_s26 + $0x10] sm:$0xff]  ;;  %v57_v2 = vld [vmem:[%s3919_s26] sm:$0xff]  ;;  %v60_v3 = vld [vmem:[%s3919_s26 + $0x18] sm:$0xff]  ;;  %2735 = vmatprep.subr.bf16.mxu0 %v3085_v20 }
   0x9   :  { %78 = vperm.xlu1 %3078, %v59_v1   ;;  %72 = vperm.xlu0 %3077, %v57_v2   ;;  %v58_v4 = vld [vmem:[%s3919_s26 + $0x8] sm:$0xff]  ;;  %v61_v6 = vld [vmem:[%s3919_s26 + $0x20] sm:$0xff]  ;;  %v64_v13 = vld [vmem:[%s3919_s26 + $0x38] sm:$0xff] }
   0xa   :  { %v62_v5 = vld [vmem:[%s3919_s26 + $0x28] sm:$0xff]  ;;  %v3079_v7 = vld [vmem:[%s3920_s24] sm:$0xff]   ;;  %v63_v14 = vld [vmem:[%s3919_s26 + $0x30] sm:$0xff] }
   0xb   :  { %2719 = vmatprep.subr.bf16.mxu1 %v3079_v7  ;;  %v3081_v9 = vld [vmem:[%s3920_s24 + $0x8] sm:$0x7f]   ;;  %v65_v17 = vld [vmem:[%s3919_s26 + $0x40] sm:$0xff]  ;;  %v68_v18 = vld [vmem:[%s3919_s26 + $0x58] sm:$0xff] }
   0xc   :  { %2720 = vmatpush3.bf16.msra.mxu1 %v3079_v7  ;;  %v286_v11 = vsel %vm178_vm0, %v3081_v9, 0  ;;  %v66_v16 = vld [vmem:[%s3919_s26 + $0x48] sm:$0xff]  ;;  %v67_v19 = vld [vmem:[%s3919_s26 + $0x50] sm:$0xff] }
   0xd   :  { %81 = vperm.xlu1 %3078, %v60_v3   ;;  %75 = vperm.xlu0 %3077, %v58_v4  }
   0xe   :  { %3072 = vmatprep.subr.msk.bf16.mxu1 %vm178_vm0, %v3081_v9 }
  0x10   :  { %2722 = vmatpush3.bf16.msra.mxu1 %v286_v11 }
  0x11   :  { %87 = vperm.xlu1 %3078, %v62_v5   ;;  %84 = vperm.xlu0 %3077, %v61_v6  }
  0x12   :  { %2751 = vmatprep.subr.bf16.mxu1 %v3185_v15 }
  0x15   :  { %93 = vperm.xlu1 %3078, %v64_v13   ;;  %90 = vperm.xlu0 %3077, %v63_v14  }
  0x19   :  { %99 = vperm.xlu1 %3078, %v66_v16   ;;  %96 = vperm.xlu0 %3077, %v65_v17  }
  0x1d   :  { %105 = vperm.xlu1 %3078, %v68_v18   ;;  %102 = vperm.xlu0 %3077, %v67_v19  }
  0x88   :  { %v79_v23 = vpop.permute.xlu1 %78  ;;  %v73_v24 = vpop.permute.xlu0 %72 }
  0x89   :  { %vm109_vm1 = vcmp.eq.s32.totalorder %v79_v23, %v3335_v22  ;;  %vm107_vm2 = vcmp.eq.s32.totalorder %v73_v24, %v3335_v22 }
  0x8a   :  { %v121_v27 = vsel %vm109_vm1, 1.0, %v3185_v15  ;;  %v119_v28 = vsel %vm107_vm2, 1.0, %v3185_v15  ;;  %vm2457_vm1 = vcmask 39936  }
  0x8c   :  { %v82_v25 = vpop.permute.xlu1 %81  ;;  %v76_v26 = vpop.permute.xlu0 %75 }
  0x8d   :  { %vm110_vm3 = vcmp.eq.s32.totalorder %v82_v25, %v3335_v22  ;;  %vm108_vm4 = vcmp.eq.s32.totalorder %v76_v26, %v3335_v22 }
  0x8e   :  { %v122_v29 = vsel %vm110_vm3, 1.0, %v3185_v15  ;;  %v120_v30 = vsel %vm108_vm4, 1.0, %v3185_v15 }
  0x8f   :  { %v132_v31 = vpack.c.bf16 %v122_v29, %v121_v27  ;;  %v131_v32 = vpack.c.bf16 %v120_v30, %v119_v28 }
  0x90   :  { %v88_v34 = vpop.permute.xlu1 %87  ;;  %v85_v35 = vpop.permute.xlu0 %84 }
  0x91   :  { %vm112_vm6 = vcmp.eq.s32.totalorder %v88_v34, %v3335_v22  ;;  %vm111_vm7 = vcmp.eq.s32.totalorder %v85_v35, %v3335_v22  ;;  %2707 = vmatprep.mubr.msk.bf16.mxu0 %vm159_vm5, %v131_v32  ;;  %2723 = vmatprep.mubr.msk.bf16.mxu1 %vm159_vm5, %v131_v32 }
  0x92   :  { %v124_v37 = vsel %vm112_vm6, 1.0, %v3185_v15  ;;  %v123_v38 = vsel %vm111_vm7, 1.0, %v3185_v15  ;;  %2708 = vmatmul.mubr.msk.bf16.vlgmr.msra.gmra.mrb[0].mxu0 %vm159_vm5, %v132_v31  ;;  %2724 = vmatmul.mubr.msk.bf16.vlgmr.msra.gmra.mrb[0].mxu1 %vm159_vm5, %v132_v31 }
  0x93   :  { %v133_v39 = vpack.c.bf16 %v124_v37, %v123_v38  ;;  %2752 = vmatpush3.bf16.msra.mxu1 %v3348_v33  ;;  %2736 = vmatpush3.bf16.msra.mxu0 %v3085_v20 }
  0x94   :  { %v94_v41 = vpop.permute.xlu1 %93  ;;  %v91_v42 = vpop.permute.xlu0 %90  ;;  %2753 = vmatprep.subr.bf16.mxu1 %v3185_v15  ;;  %3073 = vmatprep.subr.msk.bf16.mxu0 %vm178_vm0, %v3086_v36  ;;  %vm2330_vm0 = vcmask 523264  }
  0x95   :  { %vm114_vm8 = vcmp.eq.s32.totalorder %v94_v41, %v3335_v22  ;;  %vm113_vm9 = vcmp.eq.s32.totalorder %v91_v42, %v3335_v22  ;;  %2711 = vmatprep.mubr.msk.bf16.mxu0 %vm159_vm5, %v133_v39  ;;  %2727 = vmatprep.mubr.msk.bf16.mxu1 %vm159_vm5, %v133_v39 }
  0x96   :  { %v126_v44 = vsel %vm114_vm8, 1.0, %v3185_v15  ;;  %v125_v45 = vsel %vm113_vm9, 1.0, %v3185_v15 }
  0x97   :  { %v134_v46 = vpack.c.bf16 %v126_v44, %v125_v45  ;;  %2754 = vmatpush3.bf16.msra.mxu1 %v3365_v40  ;;  %2738 = vmatpush3.bf16.msra.mxu0 %v392_v43 }
  0x98   :  { %v100_v47 = vpop.permute.xlu1 %99  ;;  %v97_v48 = vpop.permute.xlu0 %96  ;;  %2759 = vmatprep.subr.bf16.mxu1 %v3185_v15  ;;  %2775 = vmatprep.subr.bf16.mxu0 %v3185_v15 }
  0x99   :  { %vm116_vm10 = vcmp.eq.s32.totalorder %v100_v47, %v3335_v22  ;;  %vm115_vm11 = vcmp.eq.s32.totalorder %v97_v48, %v3335_v22  ;;  %v2493_v48 = vld [vmem:[%s3906_s6] ss:$0 sm:$0xff] }
  0x9a   :  { %v128_v49 = vsel %vm116_vm10, 1.0, %v3185_v15  ;;  %v127_v50 = vsel %vm115_vm11, 1.0, %v3185_v15  ;;  %2712 = vmatmul.mubr.msk.bf16.gmra.mrb[4].mxu0 %vm159_vm5, %v134_v46  ;;  %2728 = vmatmul.mubr.msk.bf16.gmra.mrb[4].mxu1 %vm159_vm5, %v134_v46 }
  0x9b   :  { %v135_v51 = vpack.c.bf16 %v128_v49, %v127_v50 }
  0x9c   :  { %v106_v52 = vpop.permute.xlu1 %105  ;;  %v103_v53 = vpop.permute.xlu0 %102 }
  0x9d   :  { %vm118_vm12 = vcmp.eq.s32.totalorder %v106_v52, %v3335_v22  ;;  %vm117_vm13 = vcmp.eq.s32.totalorder %v103_v53, %v3335_v22  ;;  %2715 = vmatprep.mubr.msk.bf16.mxu0 %vm159_vm5, %v135_v51  ;;  %2731 = vmatprep.mubr.msk.bf16.mxu1 %vm159_vm5, %v135_v51 }
  0x9e   :  { %v130_v54 = vsel %vm118_vm12, 1.0, %v3185_v15  ;;  %v129_v55 = vsel %vm117_vm13, 1.0, %v3185_v15 }
  0x9f   :  { %v136_v56 = vpack.c.bf16 %v130_v54, %v129_v55 }
  0xa2   :  { %2716 = vmatmul.mubr.msk.bf16.gmra.mrb[8].mxu0 %vm159_vm5, %v136_v56  ;;  %2732 = vmatmul.mubr.msk.bf16.gmra.mrb[8].mxu1 %vm159_vm5, %v136_v56 }
  0xa3   :  { %2739 = vmatprep.mubr.msk.bf16.mxu0 %vm159_vm5, %v131_v32  ;;  %2755 = vmatprep.mubr.msk.bf16.mxu1 %vm3186_vm14, %v3185_v15 }
  0xaa   :  { %2740 = vmatmul.mubr.msk.bf16.vlgmr.msra.gmra.mrb[12].mxu0 %vm159_vm5, %v132_v31  ;;  %2756 = vmatmul.mubr.bf16.vlgmr.msra.gmra.mrb[12].mxu1 %v3184_v0 }
  0xab   :  { %2743 = vmatprep.mubr.msk.bf16.mxu0 %vm159_vm5, %v133_v39  ;;  %2760 = vmatpush3.bf16.msra.mxu1 %v3399_v57 }
  0xac   :  { %2761 = vmatprep.subr.bf16.mxu1 %v3185_v15  ;;  %2763 = vmatprep.mubr.msk.bf16.mxu1 %vm3186_vm14, %v3185_v15 }
  0xad   :  { %2776 = vmatpush3.bf16.msra.mxu0 %v3348_v33 }
  0xae   :  { %2777 = vmatprep.subr.bf16.mxu0 %v3185_v15 }
  0xaf   :  { %2762 = vmatpush3.bf16.msra.mxu1 %v3408_v58 }
  0xb0   :  { %2767 = vmatprep.subr.bf16.mxu1 %v3185_v15 }
  0xb1   :  { %2778 = vmatpush3.bf16.msra.mxu0 %v3365_v40 }
  0xb2   :  { %2744 = vmatmul.mubr.msk.bf16.gmra.mrb[16].mxu0 %vm159_vm5, %v134_v46  ;;  %2764 = vmatmul.mubr.bf16.vlgmr.msra.gmra.mrb[16].mxu1 %v3184_v0 }
  0xb3   :  { %2747 = vmatprep.mubr.msk.bf16.mxu0 %vm159_vm5, %v135_v51  ;;  %2768 = vmatpush3.bf16.msra.mxu1 %v3419_v59 }
  0xb4   :  { %2769 = vmatprep.subr.bf16.mxu1 %v3185_v15  ;;  %2771 = vmatprep.mubr.msk.bf16.mxu1 %vm3186_vm14, %v3185_v15 }
  0xb5   :  { %2791 = vmatprep.subr.bf16.mxu0 %v3185_v15 }
  0xb7   :  { %2770 = vmatpush3.bf16.msra.mxu1 %v3430_v60 }
  0xb8   :  { %2783 = vmatprep.subr.bf16.mxu1 %v3185_v15 }
  0xba   :  { %2748 = vmatmul.mubr.msk.bf16.gmra.mrb[20].mxu0 %vm159_vm5, %v136_v56  ;;  %2772 = vmatmul.mubr.bf16.vlgmr.msra.gmra.mrb[20].mxu1 %v3184_v0 }
  0xbb   :  { %2784 = vmatpush3.bf16.msra.mxu1 %v3399_v57  ;;  %2779 = vmatprep.mubr.msk.bf16.mxu0 %vm3186_vm14, %v3185_v15 }
  0xbc   :  { %2785 = vmatprep.subr.bf16.mxu1 %v3185_v15  ;;  %2787 = vmatprep.mubr.msk.bf16.mxu1 %vm3186_vm14, %v3185_v15 }
  0xbf   :  { %2786 = vmatpush3.bf16.msra.mxu1 %v3408_v58 }
  0xc0   :  { %2799 = vmatprep.subr.bf16.mxu1 %v3185_v15 }
 0x165   :  { %v2709_v63 = vpop.f32.mrb[0].mxu0  ;;  %v2725_v0 = vpop.f32.mrb[0].mxu1 }
 0x166   :  { %v3456_v1 = vadd.f32 %v2709_v63, %v2475_v61  ;;  %v3459_v2 = vadd.f32 %v2725_v0, %v3454_v62  ;;  %v216_v3 = vpop.f32.mrb[1].mxu0  ;;  %v322_v4 = vpop.f32.mrb[1].mxu1 }
 0x167   :  { %v2710_v5 = vpop.f32.mrb[2].mxu0  ;;  %v2726_v6 = vpop.f32.mrb[2].mxu1  ;;  %v217_v49 = vadd.f32 %v2475_v61, %v216_v3 }
 0x168   :  { %v3461_v7 = vadd.f32 %v2710_v5, %v2475_v61  ;;  %v3464_v8 = vadd.f32 %v2726_v6, %v3454_v62  ;;  %v219_v9 = vpop.f32.mrb[3].mxu0  ;;  %v325_v10 = vpop.f32.mrb[3].mxu1 }
 0x169   :  { %v3466_v11 = vadd.f32 %v2475_v61, %v219_v9  ;;  %v3469_v12 = vadd.f32 %v3454_v62, %v325_v10 }
 0x16d   :  { %v2713_v13 = vpop.f32.mrb[4].mxu0  ;;  %v2729_v14 = vpop.f32.mrb[4].mxu1 }
 0x16e   :  { %v3471_v16 = vadd.f32 %v2713_v13, %v2475_v61  ;;  %v3474_v17 = vadd.f32 %v2729_v14, %v3454_v62  ;;  %v232_v18 = vpop.f32.mrb[5].mxu0  ;;  %v338_v19 = vpop.f32.mrb[5].mxu1  ;;  %v323_v13 = vadd.f32 %v3454_v62, %v322_v4 }
 0x16f   :  { %v3476_v20 = vadd.f32 %v2475_v61, %v232_v18  ;;  %v3479_v21 = vadd.f32 %v3454_v62, %v338_v19  ;;  %v2714_v22 = vpop.f32.mrb[6].mxu0  ;;  %v2730_v23 = vpop.f32.mrb[6].mxu1 }
 0x170   :  { %v3481_v24 = vadd.f32 %v2714_v22, %v2475_v61  ;;  %v3484_v25 = vadd.f32 %v2730_v23, %v3454_v62  ;;  %v235_v26 = vpop.f32.mrb[7].mxu0  ;;  %v341_v27 = vpop.f32.mrb[7].mxu1 }
 0x171   :  { %v3486_v28 = vadd.f32 %v2475_v61, %v235_v26  ;;  %v3489_v29 = vadd.f32 %v3454_v62, %v341_v27 }
 0x175   :  { %v2717_v30 = vpop.f32.mrb[8].mxu0  ;;  %v2733_v31 = vpop.f32.mrb[8].mxu1 }
 0x176   :  { %v3491_v32 = vadd.f32 %v2717_v30, %v2475_v61  ;;  %v3494_v34 = vadd.f32 %v2733_v31, %v3454_v62  ;;  %v248_v35 = vpop.f32.mrb[9].mxu0  ;;  %v354_v36 = vpop.f32.mrb[9].mxu1 }
 0x177   :  { %v3496_v37 = vadd.f32 %v2475_v61, %v248_v35  ;;  %v3499_v38 = vadd.f32 %v3454_v62, %v354_v36  ;;  %v2718_v39 = vpop.f32.mrb[10].mxu0  ;;  %v2734_v41 = vpop.f32.mrb[10].mxu1 }
 0x178   :  { %v3501_v42 = vadd.f32 %v2718_v39, %v2475_v61  ;;  %v3504_v43 = vadd.f32 %v2734_v41, %v3454_v62  ;;  %v251_v44 = vpop.f32.mrb[11].mxu0  ;;  %v357_v45 = vpop.f32.mrb[11].mxu1 }
 0x179   :  { %v3506_v46 = vadd.f32 %v2475_v61, %v251_v44  ;;  %v3509_v47 = vadd.f32 %v3454_v62, %v357_v45  ;;  %v3532_v62 = vld [vmem:[%s3907_s7] ss:$0 sm:$0xff] }
 0x17d   :  { %v2741_v50 = vpop.f32.mrb[12].mxu0  ;;  %v544_v51 = vpop.f32.mrb[12].mxu1 }
 0x17e   :  { %v3514_v52 = vadd.f32 %v2741_v50, %v2493_v48  ;;  %v602_v53 = vadd.f32 %v544_v51, %v217_v49  ;;  %v428_v54 = vpop.f32.mrb[13].mxu0  ;;  %v2757_v55 = vpop.f32.mrb[13].mxu1 }
 0x17f   :  { %v2742_v56 = vpop.f32.mrb[14].mxu0  ;;  %v547_v63 = vpop.f32.mrb[14].mxu1 }
 0x180   :  { %v603_v0 = vmul.f32 0.5, %v602_v53  ;;  %v3516_v5 = vadd.f32 %v2742_v56, %v2493_v48  ;;  %v431_v6 = vpop.f32.mrb[15].mxu0  ;;  %v2758_v9 = vpop.f32.mrb[15].mxu1 }
 0x181   :  { %v3518_v10 = vadd.f32 %v2493_v48, %v431_v6 }
 0x182   :  { %3101 = vtanh.f32 %v603_v0 }
 0x185   :  { %v2745_v61 = vpop.f32.mrb[16].mxu0  ;;  %v596_v3 = vpop.f32.mrb[16].mxu1 }
 0x186   :  { %v3521_v14 = vadd.f32 %v2745_v61, %v2493_v48  ;;  %v607_v18 = vadd.f32 %v596_v3, %v323_v13  ;;  %v444_v19 = vpop.f32.mrb[17].mxu0  ;;  %v2765_v22 = vpop.f32.mrb[17].mxu1  ;;  %v429_v61 = vadd.f32 %v2493_v48, %v428_v54 }
 0x187   :  { %v3523_v23 = vadd.f32 %v2493_v48, %v444_v19  ;;  %v2746_v26 = vpop.f32.mrb[18].mxu0  ;;  %v599_v27 = vpop.f32.mrb[18].mxu1 }
 0x188   :  { %v608_v30 = vmul.f32 0.5, %v607_v18  ;;  %v3525_v31 = vadd.f32 %v2746_v26, %v2493_v48  ;;  %v447_v35 = vpop.f32.mrb[19].mxu0  ;;  %v2766_v36 = vpop.f32.mrb[19].mxu1 }
 0x189   :  { %v3527_v39 = vadd.f32 %v2493_v48, %v447_v35 }
 0x18a   :  { %3103 = vtanh.f32 %v608_v30 }
 0x18c   :  { %v3102_v4 = vpop.eup %3101 }
 0x18d   :  { %v605_v41 = vmul.f32 0.5, %v3102_v4  ;;  %v2749_v44 = vpop.f32.mrb[20].mxu0  ;;  %v658_v45 = vpop.f32.mrb[20].mxu1 }
 0x18e   :  { %v3534_v49 = vadd.f32 %v2749_v44, %v2493_v48  ;;  %v659_v50 = vadd.f32 %v3532_v62, %v658_v45  ;;  %v460_v51 = vpop.f32.mrb[21].mxu0  ;;  %v2773_v53 = vpop.f32.mrb[21].mxu1 }
 0x18f   :  { %v606_v55 = vadd.f32 0.5, %v605_v41  ;;  %v3537_v56 = vadd.f32 %v2493_v48, %v460_v51  ;;  %v2750_v63 = vpop.f32.mrb[22].mxu0  ;;  %v661_v0 = vpop.f32.mrb[22].mxu1 }
 0x190   :  { %v3539_v6 = vadd.f32 %v2750_v63, %v2493_v48  ;;  %v463_v9 = vpop.f32.mrb[23].mxu0  ;;  %v2774_v13 = vpop.f32.mrb[23].mxu1 }
 0x191   :  { %v664_v3 = vmul.f32 %v659_v50, %v606_v55  ;;  %v3541_v18 = vadd.f32 %v2493_v48, %v463_v9 }
 0x193   :  { %v665_v19 = vadd.f32 %v664_v3, %v429_v61 }
 0x194   :  { %v3104_v22 = vpop.eup %3103 }
 0x195   :  { %3105 = vtanh.f32 %v665_v19  ;;  %v610_v26 = vmul.f32 0.5, %v3104_v22 }
 0x197   :  { %v611_v27 = vadd.f32 0.5, %v610_v26 }
 0x199   :  { %v667_v30 = vsub.f32 1.0, %v611_v27  ;;  %v669_v36 = vmul.f32 0.0, %v611_v27 }
 0x19f   :  { %v3106_v35 = vpop.eup %3105 }
 0x1a0   :  { %v668_v4 = vmul.f32 %v3106_v35, %v667_v30 }
 0x1a2   :  { %v670_v41 = vadd.f32 %v669_v36, %v668_v4 }
 0x1a4   :  { %v671_v44 = vpack.c.bf16 %v670_v41, %v670_v41 }
 0x1a6   :  { %2780 = vmatmul.mubr.msk.bf16.vlgmr.msra.gmra.mrb[24].mxu0 %vm506_vm15, %v671_v44  ;;  %2788 = vmatmul.mubr.msk.bf16.vlgmr.msra.gmra.mrb[24].mxu1 %vm506_vm15, %v671_v44 }
 0x1a7   :  { %2792 = vmatpush3.bf16.msra.mxu0 %v3419_v59  ;;  %2795 = vmatprep.mubr.msk.bf16.mxu0 %vm3186_vm14, %v3185_v15 }
 0x1a8   :  { %2793 = vmatprep.subr.bf16.mxu0 %v3185_v15  ;;  %2800 = vmatpush3.bf16.msra.mxu1 %v3348_v33 }
 0x1a9   :  { %2801 = vmatprep.subr.bf16.mxu1 %v3185_v15  ;;  %2803 = vmatprep.mubr.msk.bf16.mxu1 %vm3186_vm14, %v3185_v15 }
 0x1ab   :  { %2794 = vmatpush3.bf16.msra.mxu0 %v3430_v60 }
 0x1ac   :  { %2807 = vmatprep.subr.bf16.mxu0 %v3185_v15  ;;  %2802 = vmatpush3.bf16.msra.mxu1 %v3365_v40 }
 0x1ad   :  { %2815 = vmatprep.subr.bf16.mxu1 %v3185_v15 }
 0x1ae   :  { %2796 = vmatmul.mubr.msk.bf16.vlgmr.msra.gmra.mrb[28].mxu0 %vm506_vm15, %v671_v44 }
 0x1af   :  { %2808 = vmatpush3.bf16.msra.mxu0 %v3399_v57  ;;  %2811 = vmatprep.mubr.msk.bf16.mxu0 %vm3186_vm14, %v3185_v15 }
 0x1b0   :  { %2809 = vmatprep.subr.bf16.mxu0 %v3185_v15 }
 0x1b3   :  { %2810 = vmatpush3.bf16.msra.mxu0 %v3408_v58 }
 0x1b4   :  { %2823 = vmatprep.subr.bf16.mxu0 %v3185_v15 }
 0x279   :  { %v709_v48 = vpop.f32.mrb[24].mxu0  ;;  %v749_v54 = vpop.f32.mrb[24].mxu1 }
 0x27a   :  { %v755_v45 = vadd.f32 %v709_v48, %v3466_v11  ;;  %v760_v50 = vadd.f32 %v749_v54, %v3469_v12  ;;  %v2781_v51 = vpop.f32.mrb[25].mxu0  ;;  %v2789_v53 = vpop.f32.mrb[25].mxu1 }
 0x27b   :  { %v712_v55 = vpop.f32.mrb[26].mxu0  ;;  %v752_v63 = vpop.f32.mrb[26].mxu1 }
 0x27c   :  { %v756_v0 = vmul.f32 0.5, %v755_v45  ;;  %v2782_v9 = vpop.f32.mrb[27].mxu0  ;;  %v2790_v13 = vpop.f32.mrb[27].mxu1  ;;  %v761_v61 = vmul.f32 0.5, %v760_v50 }
 0x27e   :  { %3107 = vtanh.f32 %v756_v0 }
 0x27f   :  { %3109 = vtanh.f32 %v761_v61 }
 0x281   :  { %v799_v3 = vpop.f32.mrb[28].mxu0 }
 0x282   :  { %v2797_v19 = vpop.f32.mrb[29].mxu0  ;;  %v800_v11 = vadd.f32 %v3532_v62, %v799_v3 }
 0x283   :  { %v802_v22 = vpop.f32.mrb[30].mxu0 }
 0x284   :  { %v2798_v26 = vpop.f32.mrb[31].mxu0 }
 0x288   :  { %v3108_v27 = vpop.eup %3107 }
 0x289   :  { %v758_v30 = vmul.f32 0.5, %v3108_v27  ;;  %v3110_v36 = vpop.eup %3109 }
 0x28a   :  { %v763_v44 = vmul.f32 0.5, %v3110_v36 }
 0x28b   :  { %v759_v35 = vadd.f32 0.5, %v758_v30 }
 0x28c   :  { %v764_v48 = vadd.f32 0.5, %v763_v44 }
 0x28d   :  { %v805_v12 = vmul.f32 %v800_v11, %v759_v35 }
 0x28e   :  { %v808_v54 = vsub.f32 1.0, %v764_v48  ;;  %v810_v50 = vmul.f32 %v764_v48, %v670_v41 }
 0x28f   :  { %v806_v4 = vadd.f32 %v805_v12, %v3518_v10 }
 0x291   :  { %3111 = vtanh.f32 %v806_v4 }
 0x29b   :  { %v3112_v45 = vpop.eup %3111 }
 0x29c   :  { %v809_v51 = vmul.f32 %v3112_v45, %v808_v54 }
 0x29e   :  { %v811_v53 = vadd.f32 %v810_v50, %v809_v51 }
 0x2a0   :  { %v812_v55 = vpack.c.bf16 %v811_v53, %v811_v53 }
 0x2a2   :  { %2804 = vmatmul.mubr.msk.bf16.vlgmr.msra.gmra.mrb[28].mxu1 %vm506_vm15, %v812_v55  ;;  %2812 = vmatmul.mubr.msk.bf16.vlgmr.msra.gmra.mrb[32].mxu0 %vm506_vm15, %v812_v55 }
 0x2a3   :  { %2816 = vmatpush3.bf16.msra.mxu1 %v3419_v59  ;;  %2819 = vmatprep.mubr.msk.bf16.mxu1 %vm3186_vm14, %v3185_v15 }
 0x2a4   :  { %2817 = vmatprep.subr.bf16.mxu1 %v3185_v15  ;;  %2824 = vmatpush3.bf16.msra.mxu0 %v3348_v33 }
 0x2a5   :  { %2825 = vmatprep.subr.bf16.mxu0 %v3185_v15  ;;  %2827 = vmatprep.mubr.msk.bf16.mxu0 %vm3186_vm14, %v3185_v15 }
 0x2a7   :  { %2818 = vmatpush3.bf16.msra.mxu1 %v3430_v60 }
 0x2a8   :  { %2831 = vmatprep.subr.bf16.mxu1 %v3185_v15  ;;  %2826 = vmatpush3.bf16.msra.mxu0 %v3365_v40 }
 0x2a9   :  { %2839 = vmatprep.subr.bf16.mxu0 %v3185_v15 }
 0x2aa   :  { %2820 = vmatmul.mubr.msk.bf16.vlgmr.msra.gmra.mrb[32].mxu1 %vm506_vm15, %v812_v55 }
 0x2ab   :  { %2832 = vmatpush3.bf16.msra.mxu1 %v3399_v57  ;;  %2835 = vmatprep.mubr.msk.bf16.mxu1 %vm3186_vm14, %v3185_v15 }
 0x2ac   :  { %2833 = vmatprep.subr.bf16.mxu1 %v3185_v15 }
 0x2af   :  { %2834 = vmatpush3.bf16.msra.mxu1 %v3408_v58 }
 0x2b0   :  { %2847 = vmatprep.subr.bf16.mxu1 %v3185_v15 }
 0x375   :  { %v850_v10 = vpop.f32.mrb[28].mxu1  ;;  %v890_v41 = vpop.f32.mrb[32].mxu0 }
 0x376   :  { %v896_v63 = vadd.f32 %v850_v10, %v3456_v1  ;;  %v901_v0 = vadd.f32 %v890_v41, %v3459_v2  ;;  %v2805_v9 = vpop.f32.mrb[29].mxu1  ;;  %v2813_v13 = vpop.f32.mrb[33].mxu0 }
 0x377   :  { %v853_v61 = vpop.f32.mrb[30].mxu1  ;;  %v893_v3 = vpop.f32.mrb[34].mxu0 }
 0x378   :  { %v897_v19 = vmul.f32 0.5, %v896_v63  ;;  %v2806_v22 = vpop.f32.mrb[31].mxu1  ;;  %v2814_v26 = vpop.f32.mrb[35].mxu0  ;;  %v902_v27 = vmul.f32 0.5, %v901_v0 }
 0x37a   :  { %3113 = vtanh.f32 %v897_v19 }
 0x37b   :  { %3115 = vtanh.f32 %v902_v27 }
 0x37d   :  { %v940_v30 = vpop.f32.mrb[32].mxu1 }
 0x37e   :  { %v2821_v35 = vpop.f32.mrb[33].mxu1  ;;  %v941_v1 = vadd.f32 %v3532_v62, %v940_v30 }
 0x37f   :  { %v943_v11 = vpop.f32.mrb[34].mxu1 }
 0x380   :  { %v2822_v12 = vpop.f32.mrb[35].mxu1 }
 0x384   :  { %v3114_v36 = vpop.eup %3113 }
 0x385   :  { %v899_v4 = vmul.f32 0.5, %v3114_v36  ;;  %v3116_v48 = vpop.eup %3115 }
 0x386   :  { %v904_v45 = vmul.f32 0.5, %v3116_v48 }
 0x387   :  { %v900_v44 = vadd.f32 0.5, %v899_v4 }
 0x388   :  { %v905_v50 = vadd.f32 0.5, %v904_v45 }
 0x389   :  { %v946_v2 = vmul.f32 %v941_v1, %v900_v44 }
 0x38a   :  { %v949_v51 = vsub.f32 1.0, %v905_v50  ;;  %v951_v10 = vmul.f32 %v905_v50, %v811_v53 }
 0x38b   :  { %v947_v54 = vadd.f32 %v946_v2, %v3514_v52 }
 0x38d   :  { %3117 = vtanh.f32 %v947_v54 }
 0x397   :  { %v3118_v55 = vpop.eup %3117 }
 0x398   :  { %v950_v41 = vmul.f32 %v3118_v55, %v949_v51 }
 0x39a   :  { %v952_v63 = vadd.f32 %v951_v10, %v950_v41 }
 0x39c   :  { %v953_v0 = vpack.c.bf16 %v952_v63, %v952_v63 }
 0x39e   :  { %2828 = vmatmul.mubr.msk.bf16.vlgmr.msra.gmra.mrb[36].mxu0 %vm506_vm15, %v953_v0  ;;  %2836 = vmatmul.mubr.msk.bf16.vlgmr.msra.gmra.mrb[36].mxu1 %vm506_vm15, %v953_v0 }
 0x39f   :  { %2840 = vmatpush3.bf16.msra.mxu0 %v3419_v59  ;;  %2843 = vmatprep.mubr.msk.bf16.mxu0 %vm3186_vm14, %v3185_v15 }
 0x3a0   :  { %2841 = vmatprep.subr.bf16.mxu0 %v3185_v15  ;;  %2848 = vmatpush3.bf16.msra.mxu1 %v3348_v33 }
 0x3a1   :  { %2849 = vmatprep.subr.bf16.mxu1 %v3185_v15  ;;  %2851 = vmatprep.mubr.msk.bf16.mxu1 %vm3186_vm14, %v3185_v15 }
 0x3a3   :  { %2842 = vmatpush3.bf16.msra.mxu0 %v3430_v60 }
 0x3a4   :  { %2855 = vmatprep.subr.bf16.mxu0 %v3185_v15  ;;  %2850 = vmatpush3.bf16.msra.mxu1 %v3365_v40 }
 0x3a5   :  { %2863 = vmatprep.subr.bf16.mxu1 %v3185_v15 }
 0x3a6   :  { %2844 = vmatmul.mubr.msk.bf16.vlgmr.msra.gmra.mrb[40].mxu0 %vm506_vm15, %v953_v0 }
 0x3a7   :  { %2856 = vmatpush3.bf16.msra.mxu0 %v3399_v57  ;;  %2859 = vmatprep.mubr.msk.bf16.mxu0 %vm3186_vm14, %v3185_v15 }
 0x3a8   :  { %2857 = vmatprep.subr.bf16.mxu0 %v3185_v15 }
 0x3ab   :  { %2858 = vmatpush3.bf16.msra.mxu0 %v3408_v58 }
 0x3ac   :  { %2871 = vmatprep.subr.bf16.mxu0 %v3185_v15 }
 0x471   :  { %v991_v52 = vpop.f32.mrb[36].mxu0  ;;  %v1031_v53 = vpop.f32.mrb[36].mxu1 }
 0x472   :  { %v1037_v9 = vadd.f32 %v991_v52, %v3461_v7  ;;  %v1042_v13 = vadd.f32 %v1031_v53, %v3464_v8  ;;  %v2829_v61 = vpop.f32.mrb[37].mxu0  ;;  %v2837_v3 = vpop.f32.mrb[37].mxu1 }
 0x473   :  { %v994_v19 = vpop.f32.mrb[38].mxu0  ;;  %v1034_v22 = vpop.f32.mrb[38].mxu1 }
 0x474   :  { %v1038_v26 = vmul.f32 0.5, %v1037_v9  ;;  %v2830_v27 = vpop.f32.mrb[39].mxu0  ;;  %v2838_v30 = vpop.f32.mrb[39].mxu1  ;;  %v1043_v35 = vmul.f32 0.5, %v1042_v13 }
 0x476   :  { %3119 = vtanh.f32 %v1038_v26 }
 0x477   :  { %3121 = vtanh.f32 %v1043_v35 }
 0x479   :  { %v1081_v11 = vpop.f32.mrb[40].mxu0 }
 0x47a   :  { %v2845_v12 = vpop.f32.mrb[41].mxu0  ;;  %v1082_v7 = vadd.f32 %v3532_v62, %v1081_v11 }
 0x47b   :  { %v1084_v36 = vpop.f32.mrb[42].mxu0 }
 0x47c   :  { %v2846_v4 = vpop.f32.mrb[43].mxu0 }
 0x480   :  { %v3120_v44 = vpop.eup %3119 }
 0x481   :  { %v1040_v1 = vmul.f32 0.5, %v3120_v44  ;;  %v3122_v48 = vpop.eup %3121 }
 0x482   :  { %v1045_v45 = vmul.f32 0.5, %v3122_v48 }
 0x483   :  { %v1041_v2 = vadd.f32 0.5, %v1040_v1 }
 0x484   :  { %v1046_v50 = vadd.f32 0.5, %v1045_v45 }
 0x485   :  { %v1087_v8 = vmul.f32 %v1082_v7, %v1041_v2 }
 0x486   :  { %v1090_v51 = vsub.f32 1.0, %v1046_v50  ;;  %v1092_v10 = vmul.f32 %v1046_v50, %v952_v63 }
 0x487   :  { %v1088_v54 = vadd.f32 %v1087_v8, %v3516_v5 }
 0x489   :  { %3123 = vtanh.f32 %v1088_v54 }
 0x493   :  { %v3124_v55 = vpop.eup %3123 }
 0x494   :  { %v1091_v41 = vmul.f32 %v3124_v55, %v1090_v51 }
 0x496   :  { %v1093_v0 = vadd.f32 %v1092_v10, %v1091_v41 }
 0x498   :  { %v1094_v52 = vpack.c.bf16 %v1093_v0, %v1093_v0 }
 0x49a   :  { %2852 = vmatmul.mubr.msk.bf16.vlgmr.msra.gmra.mrb[40].mxu1 %vm506_vm15, %v1094_v52  ;;  %2860 = vmatmul.mubr.msk.bf16.vlgmr.msra.gmra.mrb[44].mxu0 %vm506_vm15, %v1094_v52 }
 0x49b   :  { %2864 = vmatpush3.bf16.msra.mxu1 %v3419_v59  ;;  %2867 = vmatprep.mubr.msk.bf16.mxu1 %vm3186_vm14, %v3185_v15 }
 0x49c   :  { %2865 = vmatprep.subr.bf16.mxu1 %v3185_v15  ;;  %2872 = vmatpush3.bf16.msra.mxu0 %v3348_v33 }
 0x49d   :  { %2873 = vmatprep.subr.bf16.mxu0 %v3185_v15  ;;  %2875 = vmatprep.mubr.msk.bf16.mxu0 %vm3186_vm14, %v3185_v15 }
 0x49f   :  { %2866 = vmatpush3.bf16.msra.mxu1 %v3430_v60 }
 0x4a0   :  { %2879 = vmatprep.subr.bf16.mxu1 %v3185_v15  ;;  %2874 = vmatpush3.bf16.msra.mxu0 %v3365_v40 }
 0x4a1   :  { %2887 = vmatprep.subr.bf16.mxu0 %v3185_v15 }
 0x4a2   :  { %2868 = vmatmul.mubr.msk.bf16.vlgmr.msra.gmra.mrb[44].mxu1 %vm506_vm15, %v1094_v52 }
 0x4a3   :  { %2880 = vmatpush3.bf16.msra.mxu1 %v3399_v57  ;;  %2883 = vmatprep.mubr.msk.bf16.mxu1 %vm3186_vm14, %v3185_v15 }
 0x4a4   :  { %2881 = vmatprep.subr.bf16.mxu1 %v3185_v15 }
 0x4a7   :  { %2882 = vmatpush3.bf16.msra.mxu1 %v3408_v58 }
 0x4a8   :  { %2895 = vmatprep.subr.bf16.mxu1 %v3185_v15 }
 0x56d   :  { %v1132_v5 = vpop.f32.mrb[40].mxu1  ;;  %v1172_v63 = vpop.f32.mrb[44].mxu0 }
 0x56e   :  { %v1178_v53 = vadd.f32 %v1132_v5, %v3476_v20  ;;  %v1183_v9 = vadd.f32 %v1172_v63, %v3479_v21  ;;  %v2853_v13 = vpop.f32.mrb[41].mxu1  ;;  %v2861_v61 = vpop.f32.mrb[45].mxu0 }
 0x56f   :  { %v1135_v3 = vpop.f32.mrb[42].mxu1  ;;  %v1175_v19 = vpop.f32.mrb[46].mxu0 }
 0x570   :  { %v1179_v22 = vmul.f32 0.5, %v1178_v53  ;;  %v2854_v26 = vpop.f32.mrb[43].mxu1  ;;  %v2862_v27 = vpop.f32.mrb[47].mxu0  ;;  %v1184_v30 = vmul.f32 0.5, %v1183_v9 }
 0x572   :  { %3125 = vtanh.f32 %v1179_v22 }
 0x573   :  { %3127 = vtanh.f32 %v1184_v30 }
 0x575   :  { %v1222_v35 = vpop.f32.mrb[44].mxu1 }
 0x576   :  { %v2869_v11 = vpop.f32.mrb[45].mxu1  ;;  %v1223_v20 = vadd.f32 %v3532_v62, %v1222_v35 }
 0x577   :  { %v1225_v12 = vpop.f32.mrb[46].mxu1 }
 0x578   :  { %v2870_v36 = vpop.f32.mrb[47].mxu1 }
 0x57c   :  { %v3126_v4 = vpop.eup %3125 }
 0x57d   :  { %v1181_v44 = vmul.f32 0.5, %v3126_v4  ;;  %v3128_v2 = vpop.eup %3127 }
 0x57e   :  { %v1186_v8 = vmul.f32 0.5, %v3128_v2 }
 0x57f   :  { %v1182_v1 = vadd.f32 0.5, %v1181_v44 }
 0x580   :  { %v1187_v48 = vadd.f32 0.5, %v1186_v8 }
 0x581   :  { %v1228_v21 = vmul.f32 %v1223_v20, %v1182_v1 }
 0x582   :  { %v1231_v54 = vsub.f32 1.0, %v1187_v48  ;;  %v1233_v50 = vmul.f32 %v1187_v48, %v1093_v0 }
 0x583   :  { %v1229_v7 = vadd.f32 %v1228_v21, %v3523_v23 }
 0x585   :  { %3129 = vtanh.f32 %v1229_v7 }
 0x58f   :  { %v3130_v45 = vpop.eup %3129 }
 0x590   :  { %v1232_v51 = vmul.f32 %v3130_v45, %v1231_v54 }
 0x592   :  { %v1234_v55 = vadd.f32 %v1233_v50, %v1232_v51 }
 0x594   :  { %v1235_v10 = vpack.c.bf16 %v1234_v55, %v1234_v55 }
 0x596   :  { %2876 = vmatmul.mubr.msk.bf16.vlgmr.msra.gmra.mrb[48].mxu0 %vm506_vm15, %v1235_v10  ;;  %2884 = vmatmul.mubr.msk.bf16.vlgmr.msra.gmra.mrb[48].mxu1 %vm506_vm15, %v1235_v10 }
 0x597   :  { %2888 = vmatpush3.bf16.msra.mxu0 %v3419_v59  ;;  %2891 = vmatprep.mubr.msk.bf16.mxu0 %vm3186_vm14, %v3185_v15 }
 0x598   :  { %2889 = vmatprep.subr.bf16.mxu0 %v3185_v15  ;;  %2896 = vmatpush3.bf16.msra.mxu1 %v3348_v33 }
 0x599   :  { %2897 = vmatprep.subr.bf16.mxu1 %v3185_v15  ;;  %2899 = vmatprep.mubr.msk.bf16.mxu1 %vm3186_vm14, %v3185_v15 }
 0x59b   :  { %2890 = vmatpush3.bf16.msra.mxu0 %v3430_v60 }
 0x59c   :  { %2903 = vmatprep.subr.bf16.mxu0 %v3185_v15  ;;  %2898 = vmatpush3.bf16.msra.mxu1 %v3365_v40 }
 0x59d   :  { %2911 = vmatprep.subr.bf16.mxu1 %v3185_v15 }
 0x59e   :  { %2892 = vmatmul.mubr.msk.bf16.vlgmr.msra.gmra.mrb[52].mxu0 %vm506_vm15, %v1235_v10 }
 0x59f   :  { %2904 = vmatpush3.bf16.msra.mxu0 %v3399_v57  ;;  %2907 = vmatprep.mubr.msk.bf16.mxu0 %vm3186_vm14, %v3185_v15 }
 0x5a0   :  { %2905 = vmatprep.subr.bf16.mxu0 %v3185_v15 }
 0x5a3   :  { %2906 = vmatpush3.bf16.msra.mxu0 %v3408_v58 }
 0x5a4   :  { %2919 = vmatprep.subr.bf16.mxu0 %v3185_v15 }
 0x669   :  { %v1273_v23 = vpop.f32.mrb[48].mxu0  ;;  %v1313_v41 = vpop.f32.mrb[48].mxu1 }
 0x66a   :  { %v1319_v0 = vadd.f32 %v1273_v23, %v3486_v28  ;;  %v1324_v52 = vadd.f32 %v1313_v41, %v3489_v29  ;;  %v2877_v5 = vpop.f32.mrb[49].mxu0  ;;  %v2885_v63 = vpop.f32.mrb[49].mxu1 }
 0x66b   :  { %v1276_v53 = vpop.f32.mrb[50].mxu0  ;;  %v1316_v9 = vpop.f32.mrb[50].mxu1 }
 0x66c   :  { %v1320_v13 = vmul.f32 0.5, %v1319_v0  ;;  %v2878_v61 = vpop.f32.mrb[51].mxu0  ;;  %v2886_v3 = vpop.f32.mrb[51].mxu1  ;;  %v1325_v19 = vmul.f32 0.5, %v1324_v52 }
 0x66e   :  { %3131 = vtanh.f32 %v1320_v13 }
 0x66f   :  { %3133 = vtanh.f32 %v1325_v19 }
 0x671   :  { %v1363_v22 = vpop.f32.mrb[52].mxu0 }
 0x672   :  { %v2893_v26 = vpop.f32.mrb[53].mxu0  ;;  %v1364_v28 = vadd.f32 %v3532_v62, %v1363_v22 }
 0x673   :  { %v1366_v27 = vpop.f32.mrb[54].mxu0 }
 0x674   :  { %v2894_v30 = vpop.f32.mrb[55].mxu0 }
 0x678   :  { %v3132_v35 = vpop.eup %3131 }
 0x679   :  { %v1322_v11 = vmul.f32 0.5, %v3132_v35  ;;  %v3134_v36 = vpop.eup %3133 }
 0x67a   :  { %v1327_v44 = vmul.f32 0.5, %v3134_v36 }
 0x67b   :  { %v1323_v12 = vadd.f32 0.5, %v1322_v11 }
 0x67c   :  { %v1328_v1 = vadd.f32 0.5, %v1327_v44 }
 0x67d   :  { %v1369_v29 = vmul.f32 %v1364_v28, %v1323_v12 }
 0x67e   :  { %v1372_v20 = vsub.f32 1.0, %v1328_v1  ;;  %v1374_v2 = vmul.f32 %v1328_v1, %v1234_v55 }
 0x67f   :  { %v1370_v4 = vadd.f32 %v1369_v29, %v3527_v39 }
 0x681   :  { %3135 = vtanh.f32 %v1370_v4 }
 0x68b   :  { %v3136_v21 = vpop.eup %3135 }
 0x68c   :  { %v1373_v7 = vmul.f32 %v3136_v21, %v1372_v20 }
 0x68e   :  { %v1375_v8 = vadd.f32 %v1374_v2, %v1373_v7 }
 0x690   :  { %v1376_v48 = vpack.c.bf16 %v1375_v8, %v1375_v8 }
 0x692   :  { %2900 = vmatmul.mubr.msk.bf16.vlgmr.msra.gmra.mrb[52].mxu1 %vm506_vm15, %v1376_v48  ;;  %2908 = vmatmul.mubr.msk.bf16.vlgmr.msra.gmra.mrb[56].mxu0 %vm506_vm15, %v1376_v48 }
 0x693   :  { %2912 = vmatpush3.bf16.msra.mxu1 %v3419_v59  ;;  %2915 = vmatprep.mubr.msk.bf16.mxu1 %vm3186_vm14, %v3185_v15 }
 0x694   :  { %2913 = vmatprep.subr.bf16.mxu1 %v3185_v15  ;;  %2920 = vmatpush3.bf16.msra.mxu0 %v3348_v33 }
 0x695   :  { %2921 = vmatprep.subr.bf16.mxu0 %v3185_v15  ;;  %2923 = vmatprep.mubr.msk.bf16.mxu0 %vm3186_vm14, %v3185_v15 }
 0x697   :  { %2914 = vmatpush3.bf16.msra.mxu1 %v3430_v60 }
 0x698   :  { %2927 = vmatprep.subr.bf16.mxu1 %v3185_v15  ;;  %2922 = vmatpush3.bf16.msra.mxu0 %v3365_v40 }
 0x699   :  { %2935 = vmatprep.subr.bf16.mxu0 %v3185_v15 }
 0x69a   :  { %2916 = vmatmul.mubr.msk.bf16.vlgmr.msra.gmra.mrb[56].mxu1 %vm506_vm15, %v1376_v48 }
 0x69b   :  { %2928 = vmatpush3.bf16.msra.mxu1 %v3399_v57  ;;  %2931 = vmatprep.mubr.msk.bf16.mxu1 %vm3186_vm14, %v3185_v15 }
 0x69c   :  { %2929 = vmatprep.subr.bf16.mxu1 %v3185_v15 }
 0x69f   :  { %2930 = vmatpush3.bf16.msra.mxu1 %v3408_v58 }
 0x6a0   :  { %2943 = vmatprep.subr.bf16.mxu1 %v3185_v15 }
 0x765   :  { %v1414_v33 = vpop.f32.mrb[52].mxu1  ;;  %v1454_v39 = vpop.f32.mrb[56].mxu0 }
 0x766   :  { %v1460_v54 = vadd.f32 %v1414_v33, %v3471_v16  ;;  %v1465_v45 = vadd.f32 %v1454_v39, %v3474_v17  ;;  %v2901_v50 = vpop.f32.mrb[53].mxu1  ;;  %v2909_v51 = vpop.f32.mrb[57].mxu0 }
 0x767   :  { %v1417_v55 = vpop.f32.mrb[54].mxu1  ;;  %v1457_v10 = vpop.f32.mrb[58].mxu0 }
 0x768   :  { %v1461_v23 = vmul.f32 0.5, %v1460_v54  ;;  %v2902_v41 = vpop.f32.mrb[55].mxu1  ;;  %v2910_v0 = vpop.f32.mrb[59].mxu0  ;;  %v1466_v52 = vmul.f32 0.5, %v1465_v45 }
 0x76a   :  { %3137 = vtanh.f32 %v1461_v23 }
 0x76b   :  { %3139 = vtanh.f32 %v1466_v52 }
 0x76d   :  { %v1504_v5 = vpop.f32.mrb[56].mxu1 }
 0x76e   :  { %v2917_v63 = vpop.f32.mrb[57].mxu1  ;;  %v1505_v16 = vadd.f32 %v3532_v62, %v1504_v5 }
 0x76f   :  { %v1507_v53 = vpop.f32.mrb[58].mxu1 }
 0x770   :  { %v2918_v9 = vpop.f32.mrb[59].mxu1 }
 0x774   :  { %v3138_v13 = vpop.eup %3137 }
 0x775   :  { %v1463_v61 = vmul.f32 0.5, %v3138_v13  ;;  %v3140_v19 = vpop.eup %3139 }
 0x776   :  { %v1468_v26 = vmul.f32 0.5, %v3140_v19 }
 0x777   :  { %v1464_v3 = vadd.f32 0.5, %v1463_v61 }
 0x778   :  { %v1469_v27 = vadd.f32 0.5, %v1468_v26 }
 0x779   :  { %v1510_v17 = vmul.f32 %v1505_v16, %v1464_v3 }
 0x77a   :  { %v1513_v30 = vsub.f32 1.0, %v1469_v27  ;;  %v1515_v11 = vmul.f32 %v1469_v27, %v1375_v8 }
 0x77b   :  { %v1511_v22 = vadd.f32 %v1510_v17, %v3521_v14  ;;  %v3702_v14 = vld [vmem:[%s3900_s8] sm:$0xff]  }
 0x77d   :  { %3141 = vtanh.f32 %v1511_v22 }
 0x787   :  { %v3142_v35 = vpop.eup %3141 }
 0x788   :  { %v1514_v12 = vmul.f32 %v3142_v35, %v1513_v30 }
 0x78a   :  { %v1516_v28 = vadd.f32 %v1515_v11, %v1514_v12 }
 0x78c   :  { %v1517_v29 = vpack.c.bf16 %v1516_v28, %v1516_v28 }
 0x78e   :  { %2924 = vmatmul.mubr.msk.bf16.vlgmr.msra.gmra.mrb[60].mxu0 %vm506_vm15, %v1517_v29  ;;  %2932 = vmatmul.mubr.msk.bf16.vlgmr.msra.gmra.mrb[60].mxu1 %vm506_vm15, %v1517_v29 }
 0x78f   :  { %2936 = vmatpush3.bf16.msra.mxu0 %v3419_v59  ;;  %2939 = vmatprep.mubr.msk.bf16.mxu0 %vm3186_vm14, %v3185_v15 }
 0x790   :  { %2937 = vmatprep.subr.bf16.mxu0 %v3185_v15  ;;  %2944 = vmatpush3.bf16.msra.mxu1 %v3702_v14 }
 0x791   :  { %2945 = vmatprep.subr.bf16.mxu1 %v3185_v15  ;;  %2947 = vmatprep.mubr.msk.bf16.mxu1 %vm3186_vm14, %v3185_v15 }
 0x793   :  { %2938 = vmatpush3.bf16.msra.mxu0 %v3430_v60 }
 0x794   :  { %2951 = vmatprep.subr.bf16.mxu0 %v3185_v15  ;;  %2946 = vmatpush3.bf16.msra.mxu1 %v3365_v40 }
 0x795   :  { %2959 = vmatprep.subr.bf16.mxu1 %v3185_v15 }
 0x796   :  { %2940 = vmatmul.mubr.msk.bf16.vlgmr.msra.gmra.mrb[64].mxu0 %vm506_vm15, %v1517_v29 }
 0x797   :  { %2952 = vmatpush3.bf16.msra.mxu0 %v3399_v57  ;;  %2955 = vmatprep.mubr.msk.bf16.mxu0 %vm3186_vm14, %v3185_v15 }
 0x798   :  { %2953 = vmatprep.subr.bf16.mxu0 %v3185_v15 }
 0x79b   :  { %2954 = vmatpush3.bf16.msra.mxu0 %v3408_v58 }
 0x79c   :  { %2967 = vmatprep.subr.bf16.mxu0 %v3185_v15 }
 0x861   :  { %v1555_v36 = vpop.f32.mrb[60].mxu0  ;;  %v1595_v4 = vpop.f32.mrb[60].mxu1 }
 0x862   :  { %v1601_v44 = vadd.f32 %v1555_v36, %v3481_v24  ;;  %v1606_v40 = vadd.f32 %v1595_v4, %v3484_v25  ;;  %v2925_v1 = vpop.f32.mrb[61].mxu0  ;;  %v2933_v20 = vpop.f32.mrb[61].mxu1 }
 0x863   :  { %v1558_v21 = vpop.f32.mrb[62].mxu0  ;;  %v1598_v2 = vpop.f32.mrb[62].mxu1 }
 0x864   :  { %v1602_v57 = vmul.f32 0.5, %v1601_v44  ;;  %v2926_v7 = vpop.f32.mrb[63].mxu0  ;;  %v2934_v8 = vpop.f32.mrb[63].mxu1  ;;  %v1607_v48 = vmul.f32 0.5, %v1606_v40 }
 0x866   :  { %3143 = vtanh.f32 %v1602_v57 }
 0x867   :  { %3145 = vtanh.f32 %v1607_v48 }
 0x869   :  { %v1645_v33 = vpop.f32.mrb[64].mxu0 }
 0x86a   :  { %v2941_v39 = vpop.f32.mrb[65].mxu0  ;;  %v1646_v24 = vadd.f32 %v3532_v62, %v1645_v33 }
 0x86b   :  { %v1648_v58 = vpop.f32.mrb[66].mxu0 }
 0x86c   :  { %v2942_v54 = vpop.f32.mrb[67].mxu0  ;;  %v3768_v58 = vld [vmem:[%s3903_s10] sm:$0xff]  }
 0x870   :  { %v3144_v45 = vpop.eup %3143 }
 0x871   :  { %v1604_v50 = vmul.f32 0.5, %v3144_v45  ;;  %v3146_v55 = vpop.eup %3145 }
 0x872   :  { %v1609_v23 = vmul.f32 0.5, %v3146_v55 }
 0x873   :  { %v1605_v51 = vadd.f32 0.5, %v1604_v50 }
 0x874   :  { %v1610_v41 = vadd.f32 0.5, %v1609_v23 }
 0x875   :  { %v1651_v25 = vmul.f32 %v1646_v24, %v1605_v51 }
 0x876   :  { %v1654_v0 = vsub.f32 1.0, %v1610_v41  ;;  %v1656_v5 = vmul.f32 %v1610_v41, %v1516_v28 }
 0x877   :  { %v1652_v10 = vadd.f32 %v1651_v25, %v3525_v31  ;;  %v3746_v31 = vld [vmem:[%s3902_s9] sm:$0xff]  }
 0x879   :  { %3147 = vtanh.f32 %v1652_v10 }
 0x883   :  { %v3148_v52 = vpop.eup %3147 }
 0x884   :  { %v1655_v63 = vmul.f32 %v3148_v52, %v1654_v0 }
 0x886   :  { %v1657_v53 = vadd.f32 %v1656_v5, %v1655_v63 }
 0x888   :  { %v1658_v9 = vpack.c.bf16 %v1657_v53, %v1657_v53 }
 0x88a   :  { %2948 = vmatmul.mubr.msk.bf16.vlgmr.msra.gmra.mrb[64].mxu1 %vm506_vm15, %v1658_v9  ;;  %2956 = vmatmul.mubr.msk.bf16.vlgmr.msra.gmra.mrb[68].mxu0 %vm506_vm15, %v1658_v9 }
 0x88b   :  { %2960 = vmatpush3.bf16.msra.mxu1 %v3419_v59  ;;  %2963 = vmatprep.mubr.msk.bf16.mxu1 %vm3186_vm14, %v3185_v15  ;;  %v3738_v59 = vld [vmem:[%s3900_s8 + $0x8] sm:$0xff]  }
 0x88c   :  { %2961 = vmatprep.subr.bf16.mxu1 %v3185_v15  ;;  %2968 = vmatpush3.bf16.msra.mxu0 %v3702_v14 }
 0x88d   :  { %2969 = vmatprep.subr.bf16.mxu0 %v3185_v15  ;;  %2971 = vmatprep.mubr.msk.bf16.mxu0 %vm3186_vm14, %v3185_v15 }
 0x88f   :  { %2962 = vmatpush3.bf16.msra.mxu1 %v3430_v60  ;;  %v3755_v60 = vld [vmem:[%s3902_s9 + $0x8] sm:$0xff]  }
 0x890   :  { %2975 = vmatprep.subr.bf16.mxu1 %v3185_v15  ;;  %2970 = vmatpush3.bf16.msra.mxu0 %v3738_v59 }
 0x891   :  { %2983 = vmatprep.subr.bf16.mxu0 %v3185_v15 }
 0x892   :  { %2964 = vmatmul.mubr.msk.bf16.vlgmr.msra.gmra.mrb[68].mxu1 %vm506_vm15, %v1658_v9 }
 0x893   :  { %2976 = vmatpush3.bf16.msra.mxu1 %v3746_v31  ;;  %2979 = vmatprep.mubr.msk.bf16.mxu1 %vm3186_vm14, %v3185_v15 }
 0x894   :  { %2977 = vmatprep.subr.bf16.mxu1 %v3185_v15 }
 0x897   :  { %2978 = vmatpush3.bf16.msra.mxu1 %v3755_v60 }
 0x898   :  { %2991 = vmatprep.subr.bf16.mxu1 %v3185_v15 }
 0x95d   :  { %v1696_v13 = vpop.f32.mrb[64].mxu1  ;;  %v1736_v61 = vpop.f32.mrb[68].mxu0 }
 0x95e   :  { %v1742_v3 = vadd.f32 %v1696_v13, %v3496_v37  ;;  %v1747_v16 = vadd.f32 %v1736_v61, %v3499_v38  ;;  %v2949_v17 = vpop.f32.mrb[65].mxu1  ;;  %v2957_v19 = vpop.f32.mrb[69].mxu0 }
 0x95f   :  { %v1699_v22 = vpop.f32.mrb[66].mxu1  ;;  %v1739_v26 = vpop.f32.mrb[70].mxu0 }
 0x960   :  { %v1743_v27 = vmul.f32 0.5, %v1742_v3  ;;  %v2950_v30 = vpop.f32.mrb[67].mxu1  ;;  %v2958_v35 = vpop.f32.mrb[71].mxu0  ;;  %v1748_v11 = vmul.f32 0.5, %v1747_v16 }
 0x962   :  { %3149 = vtanh.f32 %v1743_v27 }
 0x963   :  { %3151 = vtanh.f32 %v1748_v11 }
 0x965   :  { %v1786_v12 = vpop.f32.mrb[68].mxu1 }
 0x966   :  { %v2965_v28 = vpop.f32.mrb[69].mxu1  ;;  %v1787_v37 = vadd.f32 %v3532_v62, %v1786_v12 }
 0x967   :  { %v1789_v29 = vpop.f32.mrb[70].mxu1 }
 0x968   :  { %v2966_v36 = vpop.f32.mrb[71].mxu1 }
 0x96c   :  { %v3150_v4 = vpop.eup %3149 }
 0x96d   :  { %v1745_v44 = vmul.f32 0.5, %v3150_v4  ;;  %v3152_v1 = vpop.eup %3151 }
 0x96e   :  { %v1750_v21 = vmul.f32 0.5, %v3152_v1 }
 0x96f   :  { %v1746_v40 = vadd.f32 0.5, %v1745_v44 }
 0x970   :  { %v1751_v2 = vadd.f32 0.5, %v1750_v21 }
 0x971   :  { %v1792_v38 = vmul.f32 %v1787_v37, %v1746_v40 }
 0x972   :  { %v1795_v57 = vsub.f32 1.0, %v1751_v2  ;;  %v1797_v8 = vmul.f32 %v1751_v2, %v1657_v53 }
 0x973   :  { %v1793_v20 = vadd.f32 %v1792_v38, %v3537_v56  ;;  %v3781_v56 = vld [vmem:[%s3903_s10 + $0x8] sm:$0xff]  }
 0x975   :  { %3153 = vtanh.f32 %v1793_v20 }
 0x97f   :  { %v3154_v7 = vpop.eup %3153 }
 0x980   :  { %v1796_v48 = vmul.f32 %v3154_v7, %v1795_v57 }
 0x982   :  { %v1798_v33 = vadd.f32 %v1797_v8, %v1796_v48 }
 0x984   :  { %v1799_v39 = vpack.c.bf16 %v1798_v33, %v1798_v33 }
 0x986   :  { %2972 = vmatmul.mubr.msk.bf16.vlgmr.msra.gmra.mrb[72].mxu0 %vm506_vm15, %v1799_v39  ;;  %2980 = vmatmul.mubr.msk.bf16.vlgmr.msra.gmra.mrb[72].mxu1 %vm506_vm15, %v1799_v39 }
 0x987   :  { %2984 = vmatpush3.bf16.msra.mxu0 %v3768_v58  ;;  %2987 = vmatprep.mubr.msk.bf16.mxu0 %vm3186_vm14, %v3185_v15 }
 0x988   :  { %2985 = vmatprep.subr.bf16.mxu0 %v3185_v15  ;;  %2992 = vmatpush3.bf16.msra.mxu1 %v3702_v14 }
 0x989   :  { %2993 = vmatprep.subr.bf16.mxu1 %v3185_v15  ;;  %2995 = vmatprep.mubr.msk.bf16.mxu1 %vm3186_vm14, %v3185_v15 }
 0x98b   :  { %2986 = vmatpush3.bf16.msra.mxu0 %v3781_v56 }
 0x98c   :  { %2999 = vmatprep.subr.bf16.mxu0 %v3185_v15  ;;  %2994 = vmatpush3.bf16.msra.mxu1 %v3738_v59 }
 0x98d   :  { %3007 = vmatprep.subr.bf16.mxu1 %v3185_v15 }
 0x98e   :  { %2988 = vmatmul.mubr.msk.bf16.vlgmr.msra.gmra.mrb[76].mxu0 %vm506_vm15, %v1799_v39 }
 0x98f   :  { %3000 = vmatpush3.bf16.msra.mxu0 %v3746_v31  ;;  %3003 = vmatprep.mubr.msk.bf16.mxu0 %vm3186_vm14, %v3185_v15 }
 0x990   :  { %3001 = vmatprep.subr.bf16.mxu0 %v3185_v15 }
 0x993   :  { %3002 = vmatpush3.bf16.msra.mxu0 %v3755_v60 }
 0x994   :  { %3015 = vmatprep.subr.bf16.mxu0 %v3185_v15 }
 0xa59   :  { %v1837_v54 = vpop.f32.mrb[72].mxu0  ;;  %v1877_v45 = vpop.f32.mrb[72].mxu1 }
 0xa5a   :  { %v1883_v50 = vadd.f32 %v1837_v54, %v3506_v46  ;;  %v1888_v51 = vadd.f32 %v1877_v45, %v3509_v47  ;;  %v2973_v24 = vpop.f32.mrb[73].mxu0  ;;  %v2981_v25 = vpop.f32.mrb[73].mxu1 }
 0xa5b   :  { %v1840_v55 = vpop.f32.mrb[74].mxu0  ;;  %v1880_v10 = vpop.f32.mrb[74].mxu1 }
 0xa5c   :  { %v1884_v23 = vmul.f32 0.5, %v1883_v50  ;;  %v2974_v41 = vpop.f32.mrb[75].mxu0  ;;  %v2982_v0 = vpop.f32.mrb[75].mxu1  ;;  %v1889_v52 = vmul.f32 0.5, %v1888_v51  ;;  %v3094_v55 = vld [vmem:[%s3909_s13 + $0x8] sm:$0xff]  }
 0xa5e   :  { %3155 = vtanh.f32 %v1884_v23 }
 0xa5f   :  { %3157 = vtanh.f32 %v1889_v52 }
 0xa61   :  { %v1927_v5 = vpop.f32.mrb[76].mxu0 }
 0xa62   :  { %v2989_v63 = vpop.f32.mrb[77].mxu0  ;;  %v1928_v46 = vadd.f32 %v3532_v62, %v1927_v5 }
 0xa63   :  { %v1930_v53 = vpop.f32.mrb[78].mxu0 }
 0xa64   :  { %v2990_v9 = vpop.f32.mrb[79].mxu0 }
 0xa68   :  { %v3156_v13 = vpop.eup %3155 }
 0xa69   :  { %v1886_v61 = vmul.f32 0.5, %v3156_v13  ;;  %v3158_v16 = vpop.eup %3157 }
 0xa6a   :  { %v1891_v19 = vmul.f32 0.5, %v3158_v16 }
 0xa6b   :  { %v1887_v3 = vadd.f32 0.5, %v1886_v61 }
 0xa6c   :  { %v1892_v22 = vadd.f32 0.5, %v1891_v19 }
 0xa6d   :  { %v1933_v47 = vmul.f32 %v1928_v46, %v1887_v3 }
 0xa6e   :  { %v1936_v26 = vsub.f32 1.0, %v1892_v22  ;;  %v1938_v30 = vmul.f32 %v1892_v22, %v1798_v33 }
 0xa6f   :  { %v1934_v17 = vadd.f32 %v1933_v47, %v3541_v18 }
 0xa71   :  { %3159 = vtanh.f32 %v1934_v17 }
 0xa7b   :  { %v3160_v27 = vpop.eup %3159 }
 0xa7c   :  { %v1937_v35 = vmul.f32 %v3160_v27, %v1936_v26 }
 0xa7e   :  { %v1939_v11 = vadd.f32 %v1938_v30, %v1937_v35 }
 0xa80   :  { %v1940_v12 = vpack.c.bf16 %v1939_v11, %v1939_v11 }
 0xa82   :  { %2996 = vmatmul.mubr.msk.bf16.vlgmr.msra.gmra.mrb[76].mxu1 %vm506_vm15, %v1940_v12  ;;  %3004 = vmatmul.mubr.msk.bf16.vlgmr.msra.gmra.mrb[80].mxu0 %vm506_vm15, %v1940_v12 }
 0xa83   :  { %3008 = vmatpush3.bf16.msra.mxu1 %v3768_v58  ;;  %3011 = vmatprep.mubr.msk.bf16.mxu1 %vm3186_vm14, %v3185_v15 }
 0xa84   :  { %3009 = vmatprep.subr.bf16.mxu1 %v3185_v15  ;;  %3016 = vmatpush3.bf16.msra.mxu0 %v3702_v14 }
 0xa85   :  { %3017 = vmatprep.subr.bf16.mxu0 %v3185_v15  ;;  %3019 = vmatprep.mubr.msk.bf16.mxu0 %vm3186_vm14, %v3185_v15 }
 0xa87   :  { %3010 = vmatpush3.bf16.msra.mxu1 %v3781_v56 }
 0xa88   :  { %3023 = vmatprep.subr.bf16.mxu1 %v3185_v15  ;;  %3018 = vmatpush3.bf16.msra.mxu0 %v3738_v59 }
 0xa89   :  { %3031 = vmatprep.subr.bf16.mxu0 %v3185_v15 }
 0xa8a   :  { %3012 = vmatmul.mubr.msk.bf16.vlgmr.msra.gmra.mrb[80].mxu1 %vm506_vm15, %v1940_v12 }
 0xa8b   :  { %3024 = vmatpush3.bf16.msra.mxu1 %v3746_v31  ;;  %3027 = vmatprep.mubr.msk.bf16.mxu1 %vm3186_vm14, %v3185_v15 }
 0xa8c   :  { %3025 = vmatprep.subr.bf16.mxu1 %v3185_v15 }
 0xa8f   :  { %3026 = vmatpush3.bf16.msra.mxu1 %v3755_v60 }
 0xa90   :  { %3039 = vmatprep.subr.bf16.mxu1 %v3185_v15 }
 0xb55   :  { %v1978_v62 = vpop.f32.mrb[76].mxu1  ;;  %v2018_v18 = vpop.f32.mrb[80].mxu0 }
 0xb56   :  { %v2024_v14 = vadd.f32 %v1978_v62, %v3491_v32  ;;  %v2029_v59 = vadd.f32 %v2018_v18, %v3494_v34  ;;  %v2997_v28 = vpop.f32.mrb[77].mxu1  ;;  %v3005_v29 = vpop.f32.mrb[81].mxu0  ;;  %v3183_v32 = vld [vmem:[%s3907_s7] ss:$0 sm:$0xff] }
 0xb57   :  { %v1981_v36 = vpop.f32.mrb[78].mxu1  ;;  %v2021_v4 = vpop.f32.mrb[82].mxu0  ;;  %v3095_v29 = vld [vmem:[%s3909_s13 + $0x10] sm:$0xff]  }
 0xb58   :  { %v2025_v31 = vmul.f32 0.5, %v2024_v14  ;;  %v2998_v44 = vpop.f32.mrb[79].mxu1  ;;  %v3006_v40 = vpop.f32.mrb[83].mxu0  ;;  %v2030_v37 = vmul.f32 0.5, %v2029_v59  ;;  %v3097_v36 = vld [vmem:[%s3910_s15] sm:$0xff]   ;;  %v3098_v4 = vld [vmem:[%s3910_s15 + $0x8] sm:$0xff]  }
 0xb59   :  { %v2542_v44 = vld [vmem:[%s3911_s12] ss:$0 sm:$0xff] }
 0xb5a   :  { %3161 = vtanh.f32 %v2025_v31  ;;  %v3099_v31 = vld [vmem:[%s3910_s15 + $0x10] sm:$0xff]  }
 0xb5b   :  { %3163 = vtanh.f32 %v2030_v37 }
 0xb5d   :  { %v2068_v38 = vpop.f32.mrb[80].mxu1 }
 0xb5e   :  { %v3013_v1 = vpop.f32.mrb[81].mxu1  ;;  %v2069_v34 = vadd.f32 %v3183_v32, %v2068_v38 }
 0xb5f   :  { %v2071_v60 = vpop.f32.mrb[82].mxu1 }
 0xb60   :  { %v3014_v20 = vpop.f32.mrb[83].mxu1 }
 0xb64   :  { %v3162_v21 = vpop.eup %3161 }
 0xb65   :  { %v2027_v2 = vmul.f32 0.5, %v3162_v21  ;;  %v3164_v8 = vpop.eup %3163 }
 0xb66   :  { %v2032_v33 = vmul.f32 0.5, %v3164_v8 }
 0xb67   :  { %v2028_v57 = vadd.f32 0.5, %v2027_v2  ;;  %v3100_v2 = vld [vmem:[%s3910_s15 + $0x18] sm:$0xff]  }
 0xb68   :  { %v2033_v39 = vadd.f32 0.5, %v2032_v33  ;;  %v2552_v33 = vld [vmem:[%s3913_s16] ss:$0 sm:$0xff] }
 0xb69   :  { %v2074_v7 = vmul.f32 %v2069_v34, %v2028_v57 }
 0xb6a   :  { %v2077_v54 = vsub.f32 1.0, %v2033_v39  ;;  %v2079_v50 = vmul.f32 %v2033_v39, %v1939_v11 }
 0xb6b   :  { %v2075_v48 = vadd.f32 %v2074_v7, %v3534_v49  ;;  %v3091_v49 = vld [vmem:[%s3908_s11] sm:$0xff]  }
 0xb6d   :  { %3165 = vtanh.f32 %v2075_v48 }
 0xb77   :  { %v3166_v45 = vpop.eup %3165 }
 0xb78   :  { %v2078_v51 = vmul.f32 %v3166_v45, %v2077_v54 }
 0xb7a   :  { %v2080_v24 = vadd.f32 %v2079_v50, %v2078_v51 }
 0xb7c   :  { %v2081_v25 = vpack.c.bf16 %v2080_v24, %v2080_v24 }
 0xb7e   :  { %3020 = vmatmul.mubr.msk.bf16.vlgmr.msra.gmra.mrb[84].mxu0 %vm506_vm15, %v2081_v25  ;;  %3028 = vmatmul.mubr.msk.bf16.vlgmr.msra.gmra.mrb[84].mxu1 %vm506_vm15, %v2081_v25 }
 0xb7f   :  { %3032 = vmatpush3.bf16.msra.mxu0 %v3768_v58  ;;  %3035 = vmatprep.mubr.msk.bf16.mxu0 %vm3186_vm14, %v3185_v15  ;;  %v3092_v58 = vld [vmem:[%s3908_s11 + $0x8] sm:$0xff]  }
 0xb80   :  { %3033 = vmatprep.subr.bf16.mxu0 %v3185_v15  ;;  %3043 = vmatprep.mubr.msk.bf16.mxu1 %vm3186_vm14, %v3185_v15 }
 0xb81   :  { %3040 = vmatpush3.bf16.msra.mxu1 %v3091_v49 }
 0xb82   :  { %3041 = vmatprep.subr.bf16.mxu1 %v3185_v15 }
 0xb83   :  { %3034 = vmatpush3.bf16.msra.mxu0 %v3781_v56  ;;  %v3093_v56 = vld [vmem:[%s3909_s13] sm:$0xff]  }
 0xb84   :  { %3047 = vmatprep.subr.bf16.mxu0 %v3185_v15 }
 0xb85   :  { %3042 = vmatpush3.bf16.msra.mxu1 %v3092_v58 }
 0xb86   :  { %3036 = vmatmul.mubr.msk.bf16.vlgmr.msra.gmra.mrb[88].mxu0 %vm506_vm15, %v2081_v25  ;;  %3059 = vmatprep.subr.bf16.mxu1 %v3185_v15 }
 0xb87   :  { %3055 = vmatprep.mubr.msk.bf16.mxu0 %vm3186_vm14, %v3185_v15  ;;  %3048 = vmatpush3.bf16.msra.mxu0 %v3093_v56 }
 0xb88   :  { %3049 = vmatprep.subr.bf16.mxu0 %v3185_v15 }
 0xb8b   :  { %3050 = vmatpush3.bf16.msra.mxu0 %v3094_v55 }
 0xb8c   :  { %3051 = vmatprep.subr.bf16.mxu0 %v3185_v15 }
 0xb8f   :  { %3052 = vmatpush3.bf16.msra.mxu0 %v3095_v29 }
 0xb90   :  { %3053 = vmatprep.subr.bf16.mxu0 %v3185_v15 }
 0xc51   :  { %v2119_v10 = vpop.f32.mrb[84].mxu0  ;;  %v2159_v23 = vpop.f32.mrb[84].mxu1 }
 0xc52   :  { %v2165_v41 = vadd.f32 %v2119_v10, %v3501_v42  ;;  %v2170_v0 = vadd.f32 %v2159_v23, %v3504_v43  ;;  %v3021_v52 = vpop.f32.mrb[85].mxu0  ;;  %v3029_v5 = vpop.f32.mrb[85].mxu1 }
 0xc53   :  { %v2122_v63 = vpop.f32.mrb[86].mxu0  ;;  %v2162_v53 = vpop.f32.mrb[86].mxu1 }
 0xc54   :  { %v2166_v9 = vmul.f32 0.5, %v2165_v41  ;;  %v3022_v13 = vpop.f32.mrb[87].mxu0  ;;  %v3030_v61 = vpop.f32.mrb[87].mxu1  ;;  %v2171_v3 = vmul.f32 0.5, %v2170_v0 }
 0xc56   :  { %3167 = vtanh.f32 %v2166_v9 }
 0xc57   :  { %3169 = vtanh.f32 %v2171_v3 }
 0xc59   :  { %v2209_v46 = vpop.f32.mrb[88].mxu0 }
 0xc5a   :  { %v3037_v47 = vpop.f32.mrb[89].mxu0  ;;  %v2210_v42 = vadd.f32 %v3183_v32, %v2209_v46 }
 0xc5b   :  { %v2212_v16 = vpop.f32.mrb[90].mxu0 }
 0xc5c   :  { %v3038_v17 = vpop.f32.mrb[91].mxu0 }
 0xc60   :  { %v3168_v19 = vpop.eup %3167 }
 0xc61   :  { %v2168_v22 = vmul.f32 0.5, %v3168_v19  ;;  %v3170_v43 = vpop.eup %3169 }
 0xc62   :  { %v2173_v35 = vmul.f32 0.5, %v3170_v43 }
 0xc63   :  { %v2169_v26 = vadd.f32 0.5, %v2168_v22 }
 0xc64   :  { %v2174_v11 = vadd.f32 0.5, %v2173_v35 }
 0xc65   :  { %v2215_v27 = vmul.f32 %v2210_v42, %v2169_v26 }
 0xc66   :  { %v2218_v12 = vsub.f32 1.0, %v2174_v11  ;;  %v2220_v18 = vmul.f32 %v2174_v11, %v2080_v24 }
 0xc67   :  { %v2216_v30 = vadd.f32 %v2215_v27, %v3539_v6  ;;  %v3096_v6 = vld [vmem:[%s3909_s13 + $0x18] sm:$0xff]  }
 0xc68   :  { %3054 = vmatpush3.bf16.msra.mxu0 %v3096_v6 }
 0xc69   :  { %3171 = vtanh.f32 %v2216_v30 }
 0xc73   :  { %v3172_v62 = vpop.eup %3171 }
 0xc74   :  { %v2219_v14 = vmul.f32 %v3172_v62, %v2218_v12 }
 0xc76   :  { %v2221_v59 = vadd.f32 %v2220_v18, %v2219_v14 }
 0xc78   :  { %v2222_v28 = vpack.c.bf16 %v2221_v59, %v2221_v59 }
 0xc7a   :  { %3044 = vmatmul.mubr.msk.bf16.vlgmr.msra.gmra.mrb[88].mxu1 %vm506_vm15, %v2222_v28 }
 0xc7b   :  { %3067 = vmatprep.mubr.msk.bf16.mxu1 %vm3186_vm14, %v3185_v15  ;;  %3060 = vmatpush3.bf16.msra.mxu1 %v3097_v36 }
 0xc7c   :  { %3061 = vmatprep.subr.bf16.mxu1 %v3185_v15 }
 0xc7f   :  { %3062 = vmatpush3.bf16.msra.mxu1 %v3098_v4 }
 0xc80   :  { %3063 = vmatprep.subr.bf16.mxu1 %v3185_v15 }
 0xc83   :  { %3064 = vmatpush3.bf16.msra.mxu1 %v3099_v31 }
 0xc84   :  { %3065 = vmatprep.subr.bf16.mxu1 %v3185_v15  ;;  %v2546_v15 = vld [vmem:[%s3912_s14] ss:$0 sm:$0xff] }
 0xc87   :  { %3066 = vmatpush3.bf16.msra.mxu1 %v3100_v2 }
 0xd4d   :  { %v2283_v40 = vpop.f32.mrb[88].mxu1 }
 0xd4e   :  { %v2284_v37 = vadd.f32 %v2542_v44, %v2283_v40  ;;  %v3045_v38 = vpop.f32.mrb[89].mxu1 }
 0xd4f   :  { %v2286_v1 = vpop.f32.mrb[90].mxu1 }
 0xd50   :  { %v2289_v60 = vmax.f32 %v2284_v37, 0.0  ;;  %v3046_v20 = vpop.f32.mrb[91].mxu1 }
 0xd52   :  { %v2290_v21 = vpack.c.bf16 %v2289_v60, %v2289_v60 }
 0xd54   :  { %3056 = vmatmul.mubr.msk.bf16.vlgmr.msra.gmra.mrb[92].mxu0 %vm2330_vm0, %v2290_v21 }
 0xe27   :  { %v2368_v57 = vpop.f32.mrb[92].mxu0 }
 0xe28   :  { %v2369_v32 = vadd.f32 %v2546_v15, %v2368_v57  ;;  %v3057_v34 = vpop.f32.mrb[93].mxu0 }
 0xe29   :  { %v2371_v7 = vpop.f32.mrb[94].mxu0 }
 0xe2a   :  { %v2374_v8 = vpack.c.bf16 %v2369_v32, %v2369_v32  ;;  %v3058_v48 = vpop.f32.mrb[95].mxu0 }
 0xe2c   :  { %3068 = vmatmul.mubr.msk.bf16.vlgmr.msra.gmra.mrb[92].mxu1 %vm2330_vm0, %v2374_v8 }
 0xeff   :  { %v2451_v39 = vpop.f32.mrb[92].mxu1 }
 0xf00   :  { %v2452_v54 = vadd.f32 %v2552_v33, %v2451_v39  ;;  %v3069_v45 = vpop.f32.mrb[93].mxu1 }
 0xf01   :  { %v2454_v50 = vpop.f32.mrb[94].mxu1 }
 0xf02   :  { %v3070_v51 = vpop.f32.mrb[95].mxu1  ;;  %v2458_v24 = vsel %vm2457_vm1, %v2452_v54, -inf }
 0xf03   :  { %2459 = vmax.xlane.f32.xlu0 %v2458_v24 }
 0xf90   :  { %v2460_v25 = vpop.xlane.xlu0 %2459 }
 0xf91   :  { %v2461_v49 = vsub.f32 %v2452_v54, %v2460_v25 }
 0xf93   :  { %v2462_v58 = vmul.f32 1.442695, %v2461_v49 }
 0xf95   :  { %3173 = vpow2.f32 %v2462_v58 }
 0xf9f   :  { %v3174_v56 = vpop.eup %3173 }
 0xfa0   :  { %v2464_v55 = vsel %vm2457_vm1, %v3174_v56, 0.0 }
 0xfa1   :  { %2465 = vadd.xlane.f32.xlu1 %v2464_v55 }
0x102e   :  { %v2466_v10 = vpop.xlane.xlu1 %2465 }
0x102f   :  { %3175 = vlog2.f32 %v2466_v10 }
0x1039   :  { %v3176_v23 = vpop.eup %3175 }
0x103a   :  { %v2468_v41 = vmul.f32 0.6931472, %v3176_v23 }
0x103c   :  { %v2469_v0 = vsub.f32 %v2461_v49, %v2468_v41 }
0x103e   :  { %2470 = vst.msk [vmem:[%s3914_s17] sm:$0xff] %vm2457_vm1, %v2469_v0 }

</bundles_post_ra>
